<compile_context>
chip_gen: v7x
topology: tpu7x:2x2x1
jax: 0.10.0
libtpu: 0.0.40
codegen_flags: <defaults>
</compile_context>

<pallas_src>
import functools

import jax
import jax.numpy as jnp
from jax.experimental import pallas as pl
from jax.experimental.pallas import tpu as pltpu

INV_SQRT2 = 0.7071067811865476


# ----------------------------------------------------------------------------
# Pallas kernel: one full Block (LN -> MHSA -> proj -> residual -> LN -> FFN
# -> residual) over a row-tile holding `batch` whole batch elements.
# ----------------------------------------------------------------------------
def block_kernel(x_ref,
                 ln1g_ref, ln1b_ref,
                 wqkv_ref, bqkv_ref,
                 wo_ref, bo_ref,
                 ln2g_ref, ln2b_ref,
                 w1_ref, b1_ref, w2_ref, b2_ref,
                 out_ref,
                 *, batch, seq, heads, eps, gelu_type, compute_dtype):
    f32 = jnp.float32
    cdt = compute_dtype
    x = x_ref[...]                              # (rows, D) f32, rows = batch*seq
    rows, D = x.shape
    dh = D // heads

    def layer_norm(v, g, b):
        mu = jnp.mean(v, axis=-1, keepdims=True)
        var = jnp.mean((v - mu) ** 2, axis=-1, keepdims=True)   # biased (PyTorch)
        return (v - mu) * jax.lax.rsqrt(var + eps) * g + b

    def act(v):
        if gelu_type == 'exact':
            return 0.5 * v * (1.0 + jax.lax.erf(v * INV_SQRT2))
        return v * jax.nn.sigmoid(1.702 * v)                    # quick gelu

    # --- attention sub-block --------------------------------------------------
    h = layer_norm(x, ln1g_ref[0], ln1b_ref[0])                 # f32
    hc = h.astype(cdt)
    # Fused QKV projection: one MXU pass instead of three.  The attention
    # scale is already folded into the Q columns of wqkv/bqkv by the wrapper.
    qkv = jnp.dot(hc, wqkv_ref[...], preferred_element_type=f32) + bqkv_ref[0]

    def group(base):
        # (rows, 3D) -> per-head (batch, seq, dh) stacked along a merged
        # (head, batch) axis; group index g = hd*batch + b.
        parts = [qkv[:, base + hd * dh: base + (hd + 1) * dh].reshape(batch, seq, dh)
                 for hd in range(heads)]
        return jnp.concatenate(parts, axis=0).astype(cdt)

    qg, kg, vg = group(0), group(D), group(2 * D)

    # Batched attention over the merged (head, batch) axis; contracting the
    # last dims replaces the explicit k.T (no XLU transpose round-trip).
    s = jnp.einsum('gnd,gmd->gnm', qg, kg, preferred_element_type=f32)
    s = s - jnp.max(s, axis=-1, keepdims=True)
    p = jnp.exp(s)
    p = p * pl.reciprocal(jnp.sum(p, axis=-1, keepdims=True), approx=True)
    og = jnp.einsum('gnm,gmd->gnd', p.astype(cdt), vg,
                    preferred_element_type=f32)                 # (G, seq, dh) f32

    # Output projection without a lane-axis concat of the heads:
    #   concat_h(att_h) @ Wo == sum_h att_h @ Wo[h*dh:(h+1)*dh, :]
    wo = wo_ref[...]
    og_c = og.astype(cdt)
    att = jnp.broadcast_to(bo_ref[0], (rows, D)).astype(f32)    # init with bias
    for hd in range(heads):
        o_h = og_c[hd * batch:(hd + 1) * batch].reshape(rows, dh)
        att = att + jnp.dot(o_h, wo[hd * dh:(hd + 1) * dh, :],
                            preferred_element_type=f32)
    x1 = x + att                                                # residual, f32

    # --- feed-forward sub-block ----------------------------------------------
    h2 = layer_norm(x1, ln2g_ref[0], ln2b_ref[0])
    h2 = jnp.dot(h2.astype(cdt), w1_ref[...], preferred_element_type=f32) + b1_ref[0]
    h2 = act(h2)
    h2 = jnp.dot(h2.astype(cdt), w2_ref[...], preferred_element_type=f32) + b2_ref[0]
    out_ref[...] = (x1 + h2).astype(out_ref.dtype)


# ----------------------------------------------------------------------------
# Wrapper: one pallas_call per Block; grid over row-tiles of whole batch
# elements (one step by default, so weights are resident and never re-DMA'd).
# ----------------------------------------------------------------------------
def block_forward(x2d, p, *, batch, seq, heads, scale, eps, gelu_type,
                  compute_dtype=jnp.bfloat16, batch_tile=None):
    rows, D = x2d.shape
    assert D % heads == 0
    if batch_tile is None:
        batch_tile = batch
    assert batch % batch_tile == 0
    tile_rows = batch_tile * seq
    num_tiles = batch // batch_tile

    # Trace-time (tiny) weight prep: fuse Q|K|V, fold 1/sqrt(scale) into Q,
    # cast matmul weights to bf16 (halves weight DMA bytes); biases stay f32.
    inv = jnp.float32(float(scale) ** -0.5)
    wqkv = jnp.concatenate([p['wq'] * inv, p['wk'], p['wv']], axis=1).astype(compute_dtype)
    bqkv = jnp.concatenate([p['bq'] * inv, p['bk'], p['bv']], axis=1)
    wo = p['wo'].astype(compute_dtype)
    w1 = p['w1'].astype(compute_dtype)
    w2 = p['w2'].astype(compute_dtype)

    kernel = functools.partial(
        block_kernel, batch=batch_tile, seq=seq, heads=heads,
        eps=eps, gelu_type=gelu_type, compute_dtype=compute_dtype)

    args = (x2d,
            p['ln1g'], p['ln1b'],
            wqkv, bqkv,
            wo, p['bo'],
            p['ln2g'], p['ln2b'],
            w1, p['b1'], w2, p['b2'])

    def const_spec(a):
        nd = a.ndim
        return pl.BlockSpec(a.shape, lambda i, _nd=nd: (0,) * _nd)

    in_specs = ([pl.BlockSpec((tile_rows, D), lambda i: (i, 0))] +
                [const_spec(a) for a in args[1:]])
    out_spec = pl.BlockSpec((tile_rows, D), lambda i: (i, 0))

    return pl.pallas_call(
        kernel,
        out_shape=jax.ShapeDtypeStruct((rows, D), x2d.dtype),
        grid=(num_tiles,),
        in_specs=in_specs,
        out_specs=out_spec,
        compiler_params=pltpu.CompilerParams(
            dimension_semantics=("parallel",),
            vmem_limit_bytes=64 * 1024 * 1024),
    )(*args)


def transformer_forward(x, params, *, heads, scale, eps, gelu_type,
                        compute_dtype=jnp.bfloat16):
    B, N, D = x.shape
    h = x.reshape(B * N, D)          # row-flattened: fills sublanes per vreg
    for p in params:
        h = block_forward(h, p, batch=B, seq=N, heads=heads, scale=scale,
                          eps=eps, gelu_type=gelu_type,
                          compute_dtype=compute_dtype)
    return h.reshape(B, N, D)


# ----------------------------------------------------------------------------
# Pure-JAX f32 reference (mirrors the PyTorch module) for a correctness check.
# ----------------------------------------------------------------------------
def transformer_reference(x, params, *, heads, scale, eps, gelu_type):
    def ln(v, g, b):
        mu = jnp.mean(v, -1, keepdims=True)
        var = jnp.mean((v - mu) ** 2, -1, keepdims=True)
        return (v - mu) / jnp.sqrt(var + eps) * g + b

    def gelu(v):
        if gelu_type == 'exact':
            return 0.5 * v * (1.0 + jax.lax.erf(v * INV_SQRT2))
        return v * jax.nn.sigmoid(1.702 * v)

    B, N, D = x.shape
    dh = D // heads
    for p in params:
        h = ln(x, p['ln1g'][0], p['ln1b'][0])
        q = h @ p['wq'] + p['bq'][0]
        k = h @ p['wk'] + p['bk'][0]
        v = h @ p['wv'] + p['bv'][0]

        def split(t):
            return t.reshape(B, N, heads, dh).transpose(0, 2, 1, 3)

        q, k, v = split(q), split(k), split(v)
        s = (q @ k.transpose(0, 1, 3, 2)) / (scale ** 0.5)
        s = jax.nn.softmax(s, axis=-1)
        o = (s @ v).transpose(0, 2, 1, 3).reshape(B, N, D)
        x = x + (o @ p['wo'] + p['bo'][0])
        h2 = ln(x, p['ln2g'][0], p['ln2b'][0])
        h2 = gelu(h2 @ p['w1'] + p['b1'][0])
        x = x + (h2 @ p['w2'] + p['b2'][0])
    return x


# ----------------------------------------------------------------------------
# Deterministic synthetic parameters.
# ----------------------------------------------------------------------------
def init_block_params(key, dim, ff_dim):
    ks = jax.random.split(key, 6)

    def lin(k, din, dout):
        kw, kb = jax.random.split(k)
        w = jax.random.normal(kw, (din, dout), jnp.float32) * 0.02
        b = jax.random.normal(kb, (1, dout), jnp.float32) * 0.02
        return w, b

    wq, bq = lin(ks[0], dim, dim)
    wk, bk = lin(ks[1], dim, dim)
    wv, bv = lin(ks[2], dim, dim)
    wo, bo = lin(ks[3], dim, dim)
    w1, b1 = lin(ks[4], dim, ff_dim)
    w2, b2 = lin(ks[5], ff_dim, dim)
    return dict(
        ln1g=jnp.ones((1, dim), jnp.float32), ln1b=jnp.zeros((1, dim), jnp.float32),
        wq=wq, bq=bq, wk=wk, bk=bk, wv=wv, bv=bv, wo=wo, bo=bo,
        ln2g=jnp.ones((1, dim), jnp.float32), ln2b=jnp.zeros((1, dim), jnp.float32),
        w1=w1, b1=b1, w2=w2, b2=b2,
    )


if __name__ == "__main__":
    # Transformer(dim=32, depth=2, heads=4, ff_dim=64, eps=1e-6,
    #             att_scale='per_head', gelu_type='exact')
    B, N, DIM, DEPTH, HEADS, FF_DIM = 2, 8, 32, 2, 4, 64
    EPS = 1e-6
    ATT_SCALE = 'per_head'
    GELU_TYPE = 'exact'
    scale = DIM // HEADS if ATT_SCALE == 'per_head' else DIM

    key = jax.random.PRNGKey(0)
    kx, kp = jax.random.split(key)
    x = jax.random.normal(kx, (B, N, DIM), jnp.float32)

    layer_keys = jax.random.split(kp, DEPTH)
    params = [init_block_params(layer_keys[i], DIM, FF_DIM) for i in range(DEPTH)]

    fwd = jax.jit(functools.partial(transformer_forward, heads=HEADS, scale=scale,
                                    eps=EPS, gelu_type=GELU_TYPE))
    out = jax.block_until_ready(fwd(x, params))
    assert out.shape == (B, N, DIM)
    assert bool(jnp.all(jnp.isfinite(out)))

    ref = transformer_reference(x, params, heads=HEADS, scale=scale,
                                eps=EPS, gelu_type=GELU_TYPE)
    max_err = float(jnp.max(jnp.abs(out - ref)))
    assert max_err < 2e-2, f"max abs error vs reference: {max_err}"
    print("KERNEL_OK")
</pallas_src>

<mosaic_0001>
module attributes {stable_mosaic.version = 11 : i64} {
  func.func @block_kernel(%arg0: i32, %arg1: memref<16x32xf32, #tpu.memory_space<vmem>>, %arg2: memref<1x32xf32, #tpu.memory_space<vmem>>, %arg3: memref<1x32xf32, #tpu.memory_space<vmem>>, %arg4: memref<32x96xbf16, #tpu.memory_space<vmem>>, %arg5: memref<1x96xf32, #tpu.memory_space<vmem>>, %arg6: memref<32x32xbf16, #tpu.memory_space<vmem>>, %arg7: memref<1x32xf32, #tpu.memory_space<vmem>>, %arg8: memref<1x32xf32, #tpu.memory_space<vmem>>, %arg9: memref<1x32xf32, #tpu.memory_space<vmem>>, %arg10: memref<32x64xbf16, #tpu.memory_space<vmem>>, %arg11: memref<1x64xf32, #tpu.memory_space<vmem>>, %arg12: memref<64x32xbf16, #tpu.memory_space<vmem>>, %arg13: memref<1x32xf32, #tpu.memory_space<vmem>>, %arg14: memref<16x32xf32, #tpu.memory_space<vmem>>) attributes {dimension_semantics = [#tpu.dimension_semantics<parallel>], iteration_bounds = array<i64: 1>, scalar_prefetch = 0 : i64, scratch_operands = 0 : i64, tpu.core_type = #tpu.core_type<tc>, window_params = [{transform_indices = @transform_0, window_bounds = array<i64: 16, 32>}, {pipeline_mode = #tpu.pipeline_mode<synchronous>, transform_indices = @transform_1, window_bounds = array<i64: 1, 32>}, {pipeline_mode = #tpu.pipeline_mode<synchronous>, transform_indices = @transform_2, window_bounds = array<i64: 1, 32>}, {pipeline_mode = #tpu.pipeline_mode<synchronous>, transform_indices = @transform_3, window_bounds = array<i64: 32, 96>}, {pipeline_mode = #tpu.pipeline_mode<synchronous>, transform_indices = @transform_4, window_bounds = array<i64: 1, 96>}, {pipeline_mode = #tpu.pipeline_mode<synchronous>, transform_indices = @transform_5, window_bounds = array<i64: 32, 32>}, {pipeline_mode = #tpu.pipeline_mode<synchronous>, transform_indices = @transform_6, window_bounds = array<i64: 1, 32>}, {pipeline_mode = #tpu.pipeline_mode<synchronous>, transform_indices = @transform_7, window_bounds = array<i64: 1, 32>}, {pipeline_mode = #tpu.pipeline_mode<synchronous>, transform_indices = @transform_8, window_bounds = array<i64: 1, 32>}, {pipeline_mode = #tpu.pipeline_mode<synchronous>, transform_indices = @transform_9, window_bounds = array<i64: 32, 64>}, {pipeline_mode = #tpu.pipeline_mode<synchronous>, transform_indices = @transform_10, window_bounds = array<i64: 1, 64>}, {pipeline_mode = #tpu.pipeline_mode<synchronous>, transform_indices = @transform_11, window_bounds = array<i64: 64, 32>}, {pipeline_mode = #tpu.pipeline_mode<synchronous>, transform_indices = @transform_12, window_bounds = array<i64: 1, 32>}, {transform_indices = @transform_13, window_bounds = array<i64: 16, 32>}]} {
    %c0 = arith.constant 0 : index
    %c0_0 = arith.constant 0 : index
    %0 = vector.load %arg1[%c0, %c0_0] : memref<16x32xf32, #tpu.memory_space<vmem>>, vector<16x32xf32>
    %c0_1 = arith.constant 0 : index
    %c0_2 = arith.constant 0 : index
    %1 = vector.load %arg2[%c0_1, %c0_2] : memref<1x32xf32, #tpu.memory_space<vmem>>, vector<1x32xf32>
    %2 = vector.shape_cast %1 : vector<1x32xf32> to vector<32xf32>
    %c0_3 = arith.constant 0 : index
    %c0_4 = arith.constant 0 : index
    %3 = vector.load %arg3[%c0_3, %c0_4] : memref<1x32xf32, #tpu.memory_space<vmem>>, vector<1x32xf32>
    %4 = vector.shape_cast %3 : vector<1x32xf32> to vector<32xf32>
    %cst = arith.constant dense<0.000000e+00> : vector<16xf32>
    %5 = vector.multi_reduction <add>, %0, %cst [1] : vector<16x32xf32> to vector<16xf32>
    %6 = vector.shape_cast %5 : vector<16xf32> to vector<16x1xf32>
    %cst_5 = arith.constant 3.200000e+01 : f32
    %7 = vector.broadcast %cst_5 : f32 to vector<16x1xf32>
    %8 = arith.divf %6, %7 : vector<16x1xf32>
    %9 = vector.broadcast %8 : vector<16x1xf32> to vector<16x32xf32>
    %10 = arith.subf %0, %9 : vector<16x32xf32>
    %11 = arith.mulf %10, %10 : vector<16x32xf32>
    %cst_6 = arith.constant dense<0.000000e+00> : vector<16xf32>
    %12 = vector.multi_reduction <add>, %11, %cst_6 [1] : vector<16x32xf32> to vector<16xf32>
    %13 = vector.shape_cast %12 : vector<16xf32> to vector<16x1xf32>
    %cst_7 = arith.constant 3.200000e+01 : f32
    %14 = vector.broadcast %cst_7 : f32 to vector<16x1xf32>
    %15 = arith.divf %13, %14 : vector<16x1xf32>
    %16 = vector.broadcast %8 : vector<16x1xf32> to vector<16x32xf32>
    %17 = arith.subf %0, %16 : vector<16x32xf32>
    %cst_8 = arith.constant 9.99999997E-7 : f32
    %18 = vector.broadcast %cst_8 : f32 to vector<16x1xf32>
    %19 = arith.addf %15, %18 : vector<16x1xf32>
    %20 = math.rsqrt %19 : vector<16x1xf32>
    %21 = vector.broadcast %20 : vector<16x1xf32> to vector<16x32xf32>
    %22 = arith.mulf %17, %21 : vector<16x32xf32>
    %23 = vector.shape_cast %2 : vector<32xf32> to vector<1x32xf32>
    %24 = vector.broadcast %23 : vector<1x32xf32> to vector<16x32xf32>
    %25 = arith.mulf %22, %24 : vector<16x32xf32>
    %26 = vector.shape_cast %4 : vector<32xf32> to vector<1x32xf32>
    %27 = vector.broadcast %26 : vector<1x32xf32> to vector<16x32xf32>
    %28 = arith.addf %25, %27 : vector<16x32xf32>
    %29 = arith.truncf %28 : vector<16x32xf32> to vector<16x32xbf16>
    %c0_9 = arith.constant 0 : index
    %c0_10 = arith.constant 0 : index
    %30 = vector.load %arg4[%c0_9, %c0_10] : memref<32x96xbf16, #tpu.memory_space<vmem>>, vector<32x96xbf16>
    %cst_11 = arith.constant dense<0.000000e+00> : vector<16x96xf32>
    %31 = tpu.matmul %29, %30, %cst_11 {dimension_numbers = #tpu.dot_dimension_numbers<[1], [0], [0], [1], [0, 0, 1, 1], [], []>} : vector<16x32xbf16>, vector<32x96xbf16>, vector<16x96xf32> -> vector<16x96xf32>
    %c0_12 = arith.constant 0 : index
    %c0_13 = arith.constant 0 : index
    %32 = vector.load %arg5[%c0_12, %c0_13] : memref<1x96xf32, #tpu.memory_space<vmem>>, vector<1x96xf32>
    %33 = vector.shape_cast %32 : vector<1x96xf32> to vector<96xf32>
    %34 = vector.shape_cast %33 : vector<96xf32> to vector<1x96xf32>
    %35 = vector.broadcast %34 : vector<1x96xf32> to vector<16x96xf32>
    %36 = arith.addf %31, %35 : vector<16x96xf32>
    %37 = vector.extract_strided_slice %36 {offsets = [0, 0], sizes = [16, 8], strides = [1, 1]} : vector<16x96xf32> to vector<16x8xf32>
    %38 = vector.shape_cast %37 : vector<16x8xf32> to vector<2x8x8xf32>
    %39 = vector.extract_strided_slice %36 {offsets = [0, 8], sizes = [16, 8], strides = [1, 1]} : vector<16x96xf32> to vector<16x8xf32>
    %40 = vector.shape_cast %39 : vector<16x8xf32> to vector<2x8x8xf32>
    %41 = vector.extract_strided_slice %36 {offsets = [0, 16], sizes = [16, 8], strides = [1, 1]} : vector<16x96xf32> to vector<16x8xf32>
    %42 = vector.shape_cast %41 : vector<16x8xf32> to vector<2x8x8xf32>
    %43 = vector.extract_strided_slice %36 {offsets = [0, 24], sizes = [16, 8], strides = [1, 1]} : vector<16x96xf32> to vector<16x8xf32>
    %44 = vector.shape_cast %43 : vector<16x8xf32> to vector<2x8x8xf32>
    %45 = tpu.concatenate %38, %40, %42, %44 in 0 : vector<2x8x8xf32>, vector<2x8x8xf32>, vector<2x8x8xf32>, vector<2x8x8xf32> -> vector<8x8x8xf32>
    %46 = arith.truncf %45 : vector<8x8x8xf32> to vector<8x8x8xbf16>
    %47 = vector.extract_strided_slice %36 {offsets = [0, 32], sizes = [16, 8], strides = [1, 1]} : vector<16x96xf32> to vector<16x8xf32>
    %48 = vector.shape_cast %47 : vector<16x8xf32> to vector<2x8x8xf32>
    %49 = vector.extract_strided_slice %36 {offsets = [0, 40], sizes = [16, 8], strides = [1, 1]} : vector<16x96xf32> to vector<16x8xf32>
    %50 = vector.shape_cast %49 : vector<16x8xf32> to vector<2x8x8xf32>
    %51 = vector.extract_strided_slice %36 {offsets = [0, 48], sizes = [16, 8], strides = [1, 1]} : vector<16x96xf32> to vector<16x8xf32>
    %52 = vector.shape_cast %51 : vector<16x8xf32> to vector<2x8x8xf32>
    %53 = vector.extract_strided_slice %36 {offsets = [0, 56], sizes = [16, 8], strides = [1, 1]} : vector<16x96xf32> to vector<16x8xf32>
    %54 = vector.shape_cast %53 : vector<16x8xf32> to vector<2x8x8xf32>
    %55 = tpu.concatenate %48, %50, %52, %54 in 0 : vector<2x8x8xf32>, vector<2x8x8xf32>, vector<2x8x8xf32>, vector<2x8x8xf32> -> vector<8x8x8xf32>
    %56 = arith.truncf %55 : vector<8x8x8xf32> to vector<8x8x8xbf16>
    %57 = vector.extract_strided_slice %36 {offsets = [0, 64], sizes = [16, 8], strides = [1, 1]} : vector<16x96xf32> to vector<16x8xf32>
    %58 = vector.shape_cast %57 : vector<16x8xf32> to vector<2x8x8xf32>
    %59 = vector.extract_strided_slice %36 {offsets = [0, 72], sizes = [16, 8], strides = [1, 1]} : vector<16x96xf32> to vector<16x8xf32>
    %60 = vector.shape_cast %59 : vector<16x8xf32> to vector<2x8x8xf32>
    %61 = vector.extract_strided_slice %36 {offsets = [0, 80], sizes = [16, 8], strides = [1, 1]} : vector<16x96xf32> to vector<16x8xf32>
    %62 = vector.shape_cast %61 : vector<16x8xf32> to vector<2x8x8xf32>
    %63 = vector.extract_strided_slice %36 {offsets = [0, 88], sizes = [16, 8], strides = [1, 1]} : vector<16x96xf32> to vector<16x8xf32>
    %64 = vector.shape_cast %63 : vector<16x8xf32> to vector<2x8x8xf32>
    %65 = tpu.concatenate %58, %60, %62, %64 in 0 : vector<2x8x8xf32>, vector<2x8x8xf32>, vector<2x8x8xf32>, vector<2x8x8xf32> -> vector<8x8x8xf32>
    %66 = arith.truncf %65 : vector<8x8x8xf32> to vector<8x8x8xbf16>
    "tpu.trace_start"() <{level = 10 : i32, message = "gnd,gmd->gnm"}> : () -> ()
    %cst_14 = arith.constant dense<0.000000e+00> : vector<8x8x8xf32>
    %67 = tpu.matmul %46, %56, %cst_14 {dimension_numbers = #tpu.dot_dimension_numbers<[2], [2], [1], [1], [0, 0, 0, 1, 1, 1], [0], [0]>} : vector<8x8x8xbf16>, vector<8x8x8xbf16>, vector<8x8x8xf32> -> vector<8x8x8xf32>
    "tpu.trace_stop"() : () -> ()
    %cst_15 = arith.constant dense<0xFF800000> : vector<8x8xf32>
    %68 = vector.multi_reduction <maximumf>, %67, %cst_15 [2] : vector<8x8x8xf32> to vector<8x8xf32>
    %69 = vector.shape_cast %68 : vector<8x8xf32> to vector<8x8x1xf32>
    %70 = vector.broadcast %69 : vector<8x8x1xf32> to vector<8x8x8xf32>
    %71 = arith.subf %67, %70 : vector<8x8x8xf32>
    %72 = math.exp %71 : vector<8x8x8xf32>
    %cst_16 = arith.constant dense<0.000000e+00> : vector<8x8xf32>
    %73 = vector.multi_reduction <add>, %72, %cst_16 [2] : vector<8x8x8xf32> to vector<8x8xf32>
    %74 = vector.shape_cast %73 : vector<8x8xf32> to vector<8x8x1xf32>
    %75 = tpu.reciprocal %74 {approx = true} : vector<8x8x1xf32> -> vector<8x8x1xf32>
    %76 = vector.broadcast %75 : vector<8x8x1xf32> to vector<8x8x8xf32>
    %77 = arith.mulf %72, %76 : vector<8x8x8xf32>
    %78 = arith.truncf %77 : vector<8x8x8xf32> to vector<8x8x8xbf16>
    "tpu.trace_start"() <{level = 10 : i32, message = "gnm,gmd->gnd"}> : () -> ()
    %cst_17 = arith.constant dense<0.000000e+00> : vector<8x8x8xf32>
    %79 = tpu.matmul %78, %66, %cst_17 {dimension_numbers = #tpu.dot_dimension_numbers<[2], [1], [1], [2], [0, 0, 0, 1, 1, 2], [0], [0]>} : vector<8x8x8xbf16>, vector<8x8x8xbf16>, vector<8x8x8xf32> -> vector<8x8x8xf32>
    "tpu.trace_stop"() : () -> ()
    %c0_18 = arith.constant 0 : index
    %c0_19 = arith.constant 0 : index
    %80 = vector.load %arg6[%c0_18, %c0_19] : memref<32x32xbf16, #tpu.memory_space<vmem>>, vector<32x32xbf16>
    %81 = arith.truncf %79 : vector<8x8x8xf32> to vector<8x8x8xbf16>
    %c0_20 = arith.constant 0 : index
    %c0_21 = arith.constant 0 : index
    %82 = vector.load %arg7[%c0_20, %c0_21] : memref<1x32xf32, #tpu.memory_space<vmem>>, vector<1x32xf32>
    %83 = vector.shape_cast %82 : vector<1x32xf32> to vector<32xf32>
    %84 = vector.shape_cast %83 : vector<32xf32> to vector<1x32xf32>
    %85 = vector.broadcast %84 : vector<1x32xf32> to vector<16x32xf32>
    %86 = vector.extract_strided_slice %81 {offsets = [0, 0, 0], sizes = [2, 8, 8], strides = [1, 1, 1]} : vector<8x8x8xbf16> to vector<2x8x8xbf16>
    %87 = vector.shape_cast %86 : vector<2x8x8xbf16> to vector<16x8xbf16>
    %88 = vector.extract_strided_slice %80 {offsets = [0, 0], sizes = [8, 32], strides = [1, 1]} : vector<32x32xbf16> to vector<8x32xbf16>
    %cst_22 = arith.constant dense<0.000000e+00> : vector<16x32xf32>
    %89 = tpu.matmul %87, %88, %cst_22 {dimension_numbers = #tpu.dot_dimension_numbers<[1], [0], [0], [1], [0, 0, 1, 1], [], []>} : vector<16x8xbf16>, vector<8x32xbf16>, vector<16x32xf32> -> vector<16x32xf32>
    %90 = arith.addf %85, %89 : vector<16x32xf32>
    %91 = vector.extract_strided_slice %81 {offsets = [2, 0, 0], sizes = [2, 8, 8], strides = [1, 1, 1]} : vector<8x8x8xbf16> to vector<2x8x8xbf16>
    %92 = vector.shape_cast %91 : vector<2x8x8xbf16> to vector<16x8xbf16>
    %93 = vector.extract_strided_slice %80 {offsets = [8, 0], sizes = [8, 32], strides = [1, 1]} : vector<32x32xbf16> to vector<8x32xbf16>
    %cst_23 = arith.constant dense<0.000000e+00> : vector<16x32xf32>
    %94 = tpu.matmul %92, %93, %cst_23 {dimension_numbers = #tpu.dot_dimension_numbers<[1], [0], [0], [1], [0, 0, 1, 1], [], []>} : vector<16x8xbf16>, vector<8x32xbf16>, vector<16x32xf32> -> vector<16x32xf32>
    %95 = arith.addf %90, %94 : vector<16x32xf32>
    %96 = vector.extract_strided_slice %81 {offsets = [4, 0, 0], sizes = [2, 8, 8], strides = [1, 1, 1]} : vector<8x8x8xbf16> to vector<2x8x8xbf16>
    %97 = vector.shape_cast %96 : vector<2x8x8xbf16> to vector<16x8xbf16>
    %98 = vector.extract_strided_slice %80 {offsets = [16, 0], sizes = [8, 32], strides = [1, 1]} : vector<32x32xbf16> to vector<8x32xbf16>
    %cst_24 = arith.constant dense<0.000000e+00> : vector<16x32xf32>
    %99 = tpu.matmul %97, %98, %cst_24 {dimension_numbers = #tpu.dot_dimension_numbers<[1], [0], [0], [1], [0, 0, 1, 1], [], []>} : vector<16x8xbf16>, vector<8x32xbf16>, vector<16x32xf32> -> vector<16x32xf32>
    %100 = arith.addf %95, %99 : vector<16x32xf32>
    %101 = vector.extract_strided_slice %81 {offsets = [6, 0, 0], sizes = [2, 8, 8], strides = [1, 1, 1]} : vector<8x8x8xbf16> to vector<2x8x8xbf16>
    %102 = vector.shape_cast %101 : vector<2x8x8xbf16> to vector<16x8xbf16>
    %103 = vector.extract_strided_slice %80 {offsets = [24, 0], sizes = [8, 32], strides = [1, 1]} : vector<32x32xbf16> to vector<8x32xbf16>
    %cst_25 = arith.constant dense<0.000000e+00> : vector<16x32xf32>
    %104 = tpu.matmul %102, %103, %cst_25 {dimension_numbers = #tpu.dot_dimension_numbers<[1], [0], [0], [1], [0, 0, 1, 1], [], []>} : vector<16x8xbf16>, vector<8x32xbf16>, vector<16x32xf32> -> vector<16x32xf32>
    %105 = arith.addf %100, %104 : vector<16x32xf32>
    %106 = arith.addf %0, %105 : vector<16x32xf32>
    %c0_26 = arith.constant 0 : index
    %c0_27 = arith.constant 0 : index
    %107 = vector.load %arg8[%c0_26, %c0_27] : memref<1x32xf32, #tpu.memory_space<vmem>>, vector<1x32xf32>
    %108 = vector.shape_cast %107 : vector<1x32xf32> to vector<32xf32>
    %c0_28 = arith.constant 0 : index
    %c0_29 = arith.constant 0 : index
    %109 = vector.load %arg9[%c0_28, %c0_29] : memref<1x32xf32, #tpu.memory_space<vmem>>, vector<1x32xf32>
    %110 = vector.shape_cast %109 : vector<1x32xf32> to vector<32xf32>
    %cst_30 = arith.constant dense<0.000000e+00> : vector<16xf32>
    %111 = vector.multi_reduction <add>, %106, %cst_30 [1] : vector<16x32xf32> to vector<16xf32>
    %112 = vector.shape_cast %111 : vector<16xf32> to vector<16x1xf32>
    %cst_31 = arith.constant 3.200000e+01 : f32
    %113 = vector.broadcast %cst_31 : f32 to vector<16x1xf32>
    %114 = arith.divf %112, %113 : vector<16x1xf32>
    %115 = vector.broadcast %114 : vector<16x1xf32> to vector<16x32xf32>
    %116 = arith.subf %106, %115 : vector<16x32xf32>
    %117 = arith.mulf %116, %116 : vector<16x32xf32>
    %cst_32 = arith.constant dense<0.000000e+00> : vector<16xf32>
    %118 = vector.multi_reduction <add>, %117, %cst_32 [1] : vector<16x32xf32> to vector<16xf32>
    %119 = vector.shape_cast %118 : vector<16xf32> to vector<16x1xf32>
    %cst_33 = arith.constant 3.200000e+01 : f32
    %120 = vector.broadcast %cst_33 : f32 to vector<16x1xf32>
    %121 = arith.divf %119, %120 : vector<16x1xf32>
    %122 = vector.broadcast %114 : vector<16x1xf32> to vector<16x32xf32>
    %123 = arith.subf %106, %122 : vector<16x32xf32>
    %cst_34 = arith.constant 9.99999997E-7 : f32
    %124 = vector.broadcast %cst_34 : f32 to vector<16x1xf32>
    %125 = arith.addf %121, %124 : vector<16x1xf32>
    %126 = math.rsqrt %125 : vector<16x1xf32>
    %127 = vector.broadcast %126 : vector<16x1xf32> to vector<16x32xf32>
    %128 = arith.mulf %123, %127 : vector<16x32xf32>
    %129 = vector.shape_cast %108 : vector<32xf32> to vector<1x32xf32>
    %130 = vector.broadcast %129 : vector<1x32xf32> to vector<16x32xf32>
    %131 = arith.mulf %128, %130 : vector<16x32xf32>
    %132 = vector.shape_cast %110 : vector<32xf32> to vector<1x32xf32>
    %133 = vector.broadcast %132 : vector<1x32xf32> to vector<16x32xf32>
    %134 = arith.addf %131, %133 : vector<16x32xf32>
    %135 = arith.truncf %134 : vector<16x32xf32> to vector<16x32xbf16>
    %c0_35 = arith.constant 0 : index
    %c0_36 = arith.constant 0 : index
    %136 = vector.load %arg10[%c0_35, %c0_36] : memref<32x64xbf16, #tpu.memory_space<vmem>>, vector<32x64xbf16>
    %cst_37 = arith.constant dense<0.000000e+00> : vector<16x64xf32>
    %137 = tpu.matmul %135, %136, %cst_37 {dimension_numbers = #tpu.dot_dimension_numbers<[1], [0], [0], [1], [0, 0, 1, 1], [], []>} : vector<16x32xbf16>, vector<32x64xbf16>, vector<16x64xf32> -> vector<16x64xf32>
    %c0_38 = arith.constant 0 : index
    %c0_39 = arith.constant 0 : index
    %138 = vector.load %arg11[%c0_38, %c0_39] : memref<1x64xf32, #tpu.memory_space<vmem>>, vector<1x64xf32>
    %139 = vector.shape_cast %138 : vector<1x64xf32> to vector<64xf32>
    %140 = vector.shape_cast %139 : vector<64xf32> to vector<1x64xf32>
    %141 = vector.broadcast %140 : vector<1x64xf32> to vector<16x64xf32>
    %142 = arith.addf %137, %141 : vector<16x64xf32>
    %cst_40 = arith.constant 5.000000e-01 : f32
    %143 = vector.broadcast %cst_40 : f32 to vector<16x64xf32>
    %144 = arith.mulf %143, %142 : vector<16x64xf32>
    %cst_41 = arith.constant 0.707106769 : f32
    %145 = vector.broadcast %cst_41 : f32 to vector<16x64xf32>
    %146 = arith.mulf %142, %145 : vector<16x64xf32>
    %147 = math.erf %146 : vector<16x64xf32>
    %cst_42 = arith.constant 1.000000e+00 : f32
    %148 = vector.broadcast %cst_42 : f32 to vector<16x64xf32>
    %149 = arith.addf %148, %147 : vector<16x64xf32>
    %150 = arith.mulf %144, %149 : vector<16x64xf32>
    %151 = arith.truncf %150 : vector<16x64xf32> to vector<16x64xbf16>
    %c0_43 = arith.constant 0 : index
    %c0_44 = arith.constant 0 : index
    %152 = vector.load %arg12[%c0_43, %c0_44] : memref<64x32xbf16, #tpu.memory_space<vmem>>, vector<64x32xbf16>
    %cst_45 = arith.constant dense<0.000000e+00> : vector<16x32xf32>
    %153 = tpu.matmul %151, %152, %cst_45 {dimension_numbers = #tpu.dot_dimension_numbers<[1], [0], [0], [1], [0, 0, 1, 1], [], []>} : vector<16x64xbf16>, vector<64x32xbf16>, vector<16x32xf32> -> vector<16x32xf32>
    %c0_46 = arith.constant 0 : index
    %c0_47 = arith.constant 0 : index
    %154 = vector.load %arg13[%c0_46, %c0_47] : memref<1x32xf32, #tpu.memory_space<vmem>>, vector<1x32xf32>
    %155 = vector.shape_cast %154 : vector<1x32xf32> to vector<32xf32>
    %156 = vector.shape_cast %155 : vector<32xf32> to vector<1x32xf32>
    %157 = vector.broadcast %156 : vector<1x32xf32> to vector<16x32xf32>
    %158 = arith.addf %153, %157 : vector<16x32xf32>
    %159 = arith.addf %106, %158 : vector<16x32xf32>
    %c0_48 = arith.constant 0 : index
    %c0_49 = arith.constant 0 : index
    %160 = vector.load %arg14[%c0_48, %c0_49] : memref<16x32xf32, #tpu.memory_space<vmem>>, vector<16x32xf32>
    tpu.vector_store %arg14[%c0_48, %c0_49], %159 {strides = array<i32>} : memref<16x32xf32, #tpu.memory_space<vmem>>, vector<16x32xf32>,
    return
  }
  func.func @transform_0(%arg0: i32) -> (i32, i32) {
    %c0_i32 = arith.constant 0 : i32
    %c0_i32_0 = arith.constant 0 : i32
    return %arg0, %c0_i32 : i32, i32
  }
  func.func @transform_1(%arg0: i32) -> (i32, i32) {
    %c0_i32 = arith.constant 0 : i32
    %c0_i32_0 = arith.constant 0 : i32
    %c0_i32_1 = arith.constant 0 : i32
    return %c0_i32, %c0_i32_0 : i32, i32
  }
  func.func @transform_2(%arg0: i32) -> (i32, i32) {
    %c0_i32 = arith.constant 0 : i32
    %c0_i32_0 = arith.constant 0 : i32
    %c0_i32_1 = arith.constant 0 : i32
    return %c0_i32, %c0_i32_0 : i32, i32
  }
  func.func @transform_3(%arg0: i32) -> (i32, i32) {
    %c0_i32 = arith.constant 0 : i32
    %c0_i32_0 = arith.constant 0 : i32
    %c0_i32_1 = arith.constant 0 : i32
    return %c0_i32, %c0_i32_0 : i32, i32
  }
  func.func @transform_4(%arg0: i32) -> (i32, i32) {
    %c0_i32 = arith.constant 0 : i32
    %c0_i32_0 = arith.constant 0 : i32
    %c0_i32_1 = arith.constant 0 : i32
    return %c0_i32, %c0_i32_0 : i32, i32
  }
  func.func @transform_5(%arg0: i32) -> (i32, i32) {
    %c0_i32 = arith.constant 0 : i32
    %c0_i32_0 = arith.constant 0 : i32
    %c0_i32_1 = arith.constant 0 : i32
    return %c0_i32, %c0_i32_0 : i32, i32
  }
  func.func @transform_6(%arg0: i32) -> (i32, i32) {
    %c0_i32 = arith.constant 0 : i32
    %c0_i32_0 = arith.constant 0 : i32
    %c0_i32_1 = arith.constant 0 : i32
    return %c0_i32, %c0_i32_0 : i32, i32
  }
  func.func @transform_7(%arg0: i32) -> (i32, i32) {
    %c0_i32 = arith.constant 0 : i32
    %c0_i32_0 = arith.constant 0 : i32
    %c0_i32_1 = arith.constant 0 : i32
    return %c0_i32, %c0_i32_0 : i32, i32
  }
  func.func @transform_8(%arg0: i32) -> (i32, i32) {
    %c0_i32 = arith.constant 0 : i32
    %c0_i32_0 = arith.constant 0 : i32
    %c0_i32_1 = arith.constant 0 : i32
    return %c0_i32, %c0_i32_0 : i32, i32
  }
  func.func @transform_9(%arg0: i32) -> (i32, i32) {
    %c0_i32 = arith.constant 0 : i32
    %c0_i32_0 = arith.constant 0 : i32
    %c0_i32_1 = arith.constant 0 : i32
    return %c0_i32, %c0_i32_0 : i32, i32
  }
  func.func @transform_10(%arg0: i32) -> (i32, i32) {
    %c0_i32 = arith.constant 0 : i32
    %c0_i32_0 = arith.constant 0 : i32
    %c0_i32_1 = arith.constant 0 : i32
    return %c0_i32, %c0_i32_0 : i32, i32
  }
  func.func @transform_11(%arg0: i32) -> (i32, i32) {
    %c0_i32 = arith.constant 0 : i32
    %c0_i32_0 = arith.constant 0 : i32
    %c0_i32_1 = arith.constant 0 : i32
    return %c0_i32, %c0_i32_0 : i32, i32
  }
  func.func @transform_12(%arg0: i32) -> (i32, i32) {
    %c0_i32 = arith.constant 0 : i32
    %c0_i32_0 = arith.constant 0 : i32
    %c0_i32_1 = arith.constant 0 : i32
    return %c0_i32, %c0_i32_0 : i32, i32
  }
  func.func @transform_13(%arg0: i32) -> (i32, i32) {
    %c0_i32 = arith.constant 0 : i32
    %c0_i32_0 = arith.constant 0 : i32
    return %arg0, %c0_i32 : i32, i32
  }
}

</mosaic_0001>

<bundles_post_ra>
// kernel: transformer_forward.2
= control target key start
LH: loop header
LB: loop body
LE: loop exit
PB: predicated region body
PF: predicated region fallthrough
CT: control target
= control target key end

     0   :  { %18 = vsyncpa [#allocation3], 0  ;;  %s2899_s0 = inlined_call_operand.hbm [shape: f32[16,32], index: 0, kind: input, shape index: {}]   ;;  %s2900_s1 = inlined_call_operand.hbm [shape: f32[1,32], index: 1, kind: input, shape index: {}]   ;;  %s2901_s2 = inlined_call_operand.hbm [shape: f32[1,32], index: 2, kind: input, shape index: {}]   ;;  %s2902_s3 = inlined_call_operand.hbm [shape: bf16[32,96], index: 3, kind: input, shape index: {}]   ;;  %s2903_s4 = inlined_call_operand.hbm [shape: f32[1,96], index: 4, kind: input, shape index: {}]   ;;  %s2904_s5 = inlined_call_operand.hbm [shape: bf16[32,32], index: 5, kind: input, shape index: {}]   ;;  %s2905_s6 = inlined_call_operand.hbm [shape: f32[1,32], index: 6, kind: input, shape index: {}]   ;;  %s2906_s7 = inlined_call_operand.hbm [shape: f32[1,32], index: 7, kind: input, shape index: {}]   ;;  %s2907_s8 = inlined_call_operand.hbm [shape: f32[1,32], index: 8, kind: input, shape index: {}]   ;;  %s2908_s9 = inlined_call_operand.hbm [shape: bf16[32,64], index: 9, kind: input, shape index: {}]   ;;  %s2909_s10 = inlined_call_operand.hbm [shape: f32[1,64], index: 10, kind: input, shape index: {}]   ;;  %s2910_s11 = inlined_call_operand.hbm [shape: bf16[64,32], index: 11, kind: input, shape index: {}]   ;;  %s2911_s12 = inlined_call_operand.hbm [shape: f32[1,32], index: 12, kind: input, shape index: {}]   ;;  %s2912_s13 = inlined_call_operand.hbm [shape: f32[16,32], index: 13, kind: output, shape index: {}]  }
   0x1   :  { %19 = vsyncpa [#allocation6], 0 }
   0x2   :  { %20 = vsyncpa [#allocation9], 0 }
   0x3   :  { %21 = vsyncpa [#allocation12], 0 }
   0x4   :  { %22 = vsyncpa [#allocation15], 0 }
   0x5   :  { %23 = vsyncpa [#allocation18], 0 }
   0x6   :  { %24 = vsyncpa [#allocation21], 0 }
   0x7   :  { %25 = vsyncpa [#allocation4], 0  ;;  %s2356_s25 = smov [#allocation5]   ;;  %s2357_s27 = smov [#allocation8]  }
   0x8   :  { %s44_s26 = sshll.u32 %s2356_s25, 4  ;;  %s63_s28 = sshll.u32 %s2357_s27, 4  ;;  %s45_s26 = int_to_ptr.vmem [resolvable:$true] %s44_s26  ;;  %s2450_s28 = int_to_ptr.vmem [resolvable:$true] %s63_s28 }
   0x9   :  { %s2032_s14 = scalar_lea.hbm %s2900_s1, 16 }
   0xa   :  { %p2033_p0 = scmp.ne.s32.totalorder %s2900_s1, %s2032_s14  ;;  %p2036_p1 = scmp.lt.u32.totalorder %s2032_s14, %s2900_s1 }
   0xc   :  { %p2038_p2 = pnand %p2036_p1, %p2033_p0 }
   0xe   :  { %2041 = shalt.err (!%p2038_p2)
}
   0xf   :  { %s2042_s19 = scalar_lea.vmem %s45_s26, 16  ;;  %s2046_s20 = scalar_lea.vmem %s45_s26, 32 }
  0x10   :  { %p2043_p3 = scmp.ne.s32.totalorder %s45_s26, %s2042_s19  ;;  %p2047_p4 = scmp.lt.s32.totalorder %s45_s26, %s45_s26 }
  0x11   :  { %p2048_p5 = scmp.lt.s32.totalorder %s2046_s20, %s2042_s19 }
  0x13   :  { %p2049_p6 = por %p2048_p5, %p2047_p4 }
  0x15   :  { %p2050_p7 = pnand %p2049_p6, %p2043_p3 }
  0x17   :  { %2053 = shalt.err (!%p2050_p7)
}
  0x18   :  { %47 = dma.hbm_to_vmem [thread:$0]  %s2900_s1, 16, %s45_s26, [#allocation6]  }
  0x19   :  { %s2054_s25 = scalar_lea.hbm %s2902_s3, 256 }
  0x1a   :  { %p2055_p8 = scmp.ne.s32.totalorder %s2902_s3, %s2054_s25  ;;  %p2058_p9 = scmp.lt.u32.totalorder %s2054_s25, %s2902_s3 }
  0x1c   :  { %p2060_p10 = pnand %p2058_p9, %p2055_p8 }
  0x1e   :  { %2063 = shalt.err (!%p2060_p10)
}
  0x1f   :  { %s2064_s15 = scalar_lea.vmem %s2450_s28, 256  ;;  %p2069_p12 = scmp.lt.s32.totalorder %s2450_s28, %s2450_s28 }
  0x20   :  { %p2065_p11 = scmp.ne.s32.totalorder %s2450_s28, %s2064_s15  ;;  %p2070_p13 = scmp.lt.s32.totalorder %s2064_s15, %s2064_s15 }
  0x22   :  { %p2071_p0 = por %p2070_p13, %p2069_p12 }
  0x24   :  { %p2072_p1 = pnand %p2071_p0, %p2065_p11 }
  0x26   :  { %2075 = shalt.err (!%p2072_p1)
}
  0x27   :  { %s2358_s1 = smov 64   ;;  %s2359_s26 = smov 4  }
  0x28   :  { %69 = dma.hbm_to_vmem [thread:$0]  %s2902_s3, 256, %s2450_s28, [#allocation9], %s2358_s1, %s2358_s1, %s2359_s26  }
  0x29   :  { %s2360_s18 = smov [#allocation11]   ;;  %s2361_s20 = smov [#allocation14]  }
  0x2a   :  { %s85_s19 = sshll.u32 %s2360_s18, 4  ;;  %s108_s21 = sshll.u32 %s2361_s20, 4  ;;  %s86_s19 = int_to_ptr.vmem [resolvable:$true] %s85_s19  ;;  %s109_s21 = int_to_ptr.vmem [resolvable:$true] %s108_s21 }
  0x2b   :  { %s2076_s24 = scalar_lea.hbm %s2904_s5, 256 }
  0x2c   :  { %p2077_p2 = scmp.ne.s32.totalorder %s2904_s5, %s2076_s24  ;;  %p2080_p3 = scmp.lt.u32.totalorder %s2076_s24, %s2904_s5 }
  0x2e   :  { %p2082_p4 = pnand %p2080_p3, %p2077_p2 }
  0x30   :  { %2085 = shalt.err (!%p2082_p4)
}
  0x31   :  { %s2086_s3 = scalar_lea.vmem %s86_s19, 256  ;;  %p2091_p6 = scmp.lt.s32.totalorder %s86_s19, %s86_s19 }
  0x32   :  { %p2087_p5 = scmp.ne.s32.totalorder %s86_s19, %s2086_s3  ;;  %p2092_p7 = scmp.lt.s32.totalorder %s2086_s3, %s2086_s3 }
  0x34   :  { %p2093_p8 = por %p2092_p7, %p2091_p6 }
  0x36   :  { %p2094_p9 = pnand %p2093_p8, %p2087_p5 }
  0x38   :  { %2097 = shalt.err (!%p2094_p9)
}
  0x39   :  { %91 = dma.hbm_to_vmem [thread:$0]  %s2904_s5, 256, %s86_s19, [#allocation12], %s2358_s1, %s2358_s1, %s2359_s26  }
  0x3a   :  { %s2098_s17 = scalar_lea.hbm %s2906_s7, 16 }
  0x3b   :  { %p2099_p10 = scmp.ne.s32.totalorder %s2906_s7, %s2098_s17  ;;  %p2102_p11 = scmp.lt.u32.totalorder %s2098_s17, %s2906_s7 }
  0x3d   :  { %p2104_p12 = pnand %p2102_p11, %p2099_p10 }
  0x3f   :  { %2107 = shalt.err (!%p2104_p12)
}
  0x40   :  { %s2108_s24 = scalar_lea.vmem %s109_s21, 16  ;;  %s2112_s25 = scalar_lea.vmem %s109_s21, 32 }
  0x41   :  { %p2109_p13 = scmp.ne.s32.totalorder %s109_s21, %s2108_s24  ;;  %p2113_p0 = scmp.lt.s32.totalorder %s109_s21, %s109_s21 }
  0x42   :  { %p2114_p1 = scmp.lt.s32.totalorder %s2112_s25, %s2108_s24 }
  0x44   :  { %p2115_p2 = por %p2114_p1, %p2113_p0 }
  0x46   :  { %p2116_p3 = pnand %p2115_p2, %p2109_p13 }
  0x48   :  { %2119 = shalt.err (!%p2116_p3)
}
  0x49   :  { %111 = dma.hbm_to_vmem [thread:$0]  %s2906_s7, 16, %s109_s21, [#allocation15]  }
  0x4a   :  { %s2362_s27 = smov [#allocation17]   ;;  %s2363_s30 = smov [#allocation20]  }
  0x4b   :  { %s127_s29 = sshll.u32 %s2362_s27, 4  ;;  %s149_s3 = sshll.u32 %s2363_s30, 4  ;;  %s128_s29 = int_to_ptr.vmem [resolvable:$true] %s127_s29  ;;  %s2511_s3 = int_to_ptr.vmem [resolvable:$true] %s149_s3 }
  0x4c   :  { %s2120_s15 = scalar_lea.hbm %s2908_s9, 256 }
  0x4d   :  { %p2121_p4 = scmp.ne.s32.totalorder %s2908_s9, %s2120_s15  ;;  %p2124_p5 = scmp.lt.u32.totalorder %s2120_s15, %s2908_s9 }
  0x4f   :  { %p2126_p6 = pnand %p2124_p5, %p2121_p4 }
  0x51   :  { %2129 = shalt.err (!%p2126_p6)
}
  0x52   :  { %s2130_s7 = scalar_lea.vmem %s128_s29, 256  ;;  %p2135_p8 = scmp.lt.s32.totalorder %s128_s29, %s128_s29 }
  0x53   :  { %p2131_p7 = scmp.ne.s32.totalorder %s128_s29, %s2130_s7  ;;  %p2136_p9 = scmp.lt.s32.totalorder %s2130_s7, %s2130_s7 }
  0x55   :  { %p2137_p10 = por %p2136_p9, %p2135_p8 }
  0x57   :  { %p2138_p11 = pnand %p2137_p10, %p2131_p7 }
  0x59   :  { %2141 = shalt.err (!%p2138_p11)
}
  0x5a   :  { %133 = dma.hbm_to_vmem [thread:$0]  %s2908_s9, 256, %s128_s29, [#allocation18], %s2358_s1, %s2358_s1, %s2359_s26  }
  0x5b   :  { %s2142_s25 = scalar_lea.hbm %s2910_s11, 512 }
  0x5c   :  { %p2143_p12 = scmp.ne.s32.totalorder %s2910_s11, %s2142_s25  ;;  %p2146_p13 = scmp.lt.u32.totalorder %s2142_s25, %s2910_s11 }
  0x5e   :  { %p2148_p0 = pnand %p2146_p13, %p2143_p12 }
  0x60   :  { %2151 = shalt.err (!%p2148_p0)
}
  0x61   :  { %s2152_s28 = scalar_lea.vmem %s2511_s3, 512  ;;  %p2157_p2 = scmp.lt.s32.totalorder %s2511_s3, %s2511_s3 }
  0x62   :  { %p2153_p1 = scmp.ne.s32.totalorder %s2511_s3, %s2152_s28  ;;  %p2158_p3 = scmp.lt.s32.totalorder %s2152_s28, %s2152_s28 }
  0x64   :  { %p2159_p4 = por %p2158_p3, %p2157_p2 }
  0x66   :  { %p2160_p5 = pnand %p2159_p4, %p2153_p1 }
  0x68   :  { %2163 = shalt.err (!%p2160_p5)
}
  0x69   :  { %155 = dma.hbm_to_vmem [thread:$0]  %s2910_s11, 512, %s2511_s3, [#allocation21], %s2358_s1, %s2358_s1, %s2359_s26  }
  0x6a   :  { %s2364_s14 = smov [#allocation2]   ;;  %s2164_s18 = scalar_lea.hbm %s2899_s0, 256 }
  0x6b   :  { %s31_s15 = sshll.u32 %s2364_s14, 4  ;;  %p2165_p6 = scmp.ne.s32.totalorder %s2899_s0, %s2164_s18  ;;  %s32_s15 = int_to_ptr.vmem [resolvable:$true] %s31_s15 }
  0x6c   :  { %p2168_p7 = scmp.lt.u32.totalorder %s2164_s18, %s2899_s0 }
  0x6e   :  { %p2170_p8 = pnand %p2168_p7, %p2165_p6 }
  0x70   :  { %2173 = shalt.err (!%p2170_p8)
}
  0x71   :  { %s2174_s23 = scalar_lea.vmem %s32_s15, 256  ;;  %p2179_p10 = scmp.lt.s32.totalorder %s32_s15, %s32_s15 }
  0x72   :  { %p2175_p9 = scmp.ne.s32.totalorder %s32_s15, %s2174_s23  ;;  %p2180_p11 = scmp.lt.s32.totalorder %s2174_s23, %s2174_s23 }
  0x74   :  { %p2181_p12 = por %p2180_p11, %p2179_p10 }
  0x76   :  { %p2182_p13 = pnand %p2181_p12, %p2175_p9 }
  0x78   :  { %2185 = shalt.err (!%p2182_p13)
}
  0x79   :  { %s2365_s11 = smov 128   ;;  %s2366_s26 = smov 8  }
  0x7a   :  { %37 = dma.hbm_to_vmem [thread:$0]  %s2899_s0, 256, %s32_s15, [#allocation3], %s2365_s11, %s2365_s11, %s2366_s26  }
  0x7b   :  { %s2367_s25 = smov [#allocation7]   ;;  %s2368_s19 = smov [#allocation10]  }
  0x7c   :  { %s54_s5 = sshll.u32 %s2367_s25, 4  ;;  %s76_s27 = sshll.u32 %s2368_s19, 4  ;;  %s55_s5 = int_to_ptr.vmem [resolvable:$true] %s54_s5  ;;  %s77_s27 = int_to_ptr.vmem [resolvable:$true] %s76_s27 }
  0x7d   :  { %s2186_s9 = scalar_lea.hbm %s2901_s2, 16 }
  0x7e   :  { %p2187_p0 = scmp.ne.s32.totalorder %s2901_s2, %s2186_s9  ;;  %p2190_p1 = scmp.lt.u32.totalorder %s2186_s9, %s2901_s2 }
  0x80   :  { %p2192_p2 = pnand %p2190_p1, %p2187_p0 }
  0x82   :  { %2195 = shalt.err (!%p2192_p2)
}
  0x83   :  { %s2196_s0 = scalar_lea.vmem %s55_s5, 16  ;;  %s2200_s15 = scalar_lea.vmem %s55_s5, 32 }
  0x84   :  { %p2197_p3 = scmp.ne.s32.totalorder %s55_s5, %s2196_s0  ;;  %p2201_p4 = scmp.lt.s32.totalorder %s55_s5, %s55_s5 }
  0x85   :  { %p2202_p5 = scmp.lt.s32.totalorder %s2200_s15, %s2196_s0 }
  0x87   :  { %p2203_p6 = por %p2202_p5, %p2201_p4 }
  0x89   :  { %p2204_p7 = pnand %p2203_p6, %p2197_p3 }
  0x8b   :  { %2207 = shalt.err (!%p2204_p7)
}
  0x8c   :  { %57 = dma.hbm_to_vmem [thread:$0]  %s2901_s2, 16, %s55_s5, [#allocation6]  }
  0x8d   :  { %s2208_s22 = scalar_lea.hbm %s2903_s4, 16 }
  0x8e   :  { %p2209_p8 = scmp.ne.s32.totalorder %s2903_s4, %s2208_s22  ;;  %p2212_p9 = scmp.lt.u32.totalorder %s2208_s22, %s2903_s4 }
  0x90   :  { %p2214_p10 = pnand %p2212_p9, %p2209_p8 }
  0x92   :  { %2217 = shalt.err (!%p2214_p10)
}
  0x93   :  { %s2218_s19 = scalar_lea.vmem %s77_s27, 16  ;;  %s2222_s30 = scalar_lea.vmem %s77_s27, 32 }
  0x94   :  { %p2219_p11 = scmp.ne.s32.totalorder %s77_s27, %s2218_s19  ;;  %p2223_p12 = scmp.lt.s32.totalorder %s77_s27, %s77_s27 }
  0x95   :  { %p2224_p13 = scmp.lt.s32.totalorder %s2222_s30, %s2218_s19 }
  0x97   :  { %p2225_p0 = por %p2224_p13, %p2223_p12 }
  0x99   :  { %p2226_p1 = pnand %p2225_p0, %p2219_p11 }
  0x9b   :  { %2229 = shalt.err (!%p2226_p1)
}
  0x9c   :  { %79 = dma.hbm_to_vmem [thread:$0]  %s2903_s4, 16, %s77_s27, [#allocation9]  }
  0x9d   :  { %s2369_s28 = smov [#allocation13]   ;;  %s2370_s29 = smov [#allocation16]  }
  0x9e   :  { %s98_s9 = sshll.u32 %s2369_s28, 4  ;;  %s118_s14 = sshll.u32 %s2370_s29, 4  ;;  %s99_s9 = int_to_ptr.vmem [resolvable:$true] %s98_s9  ;;  %s119_s14 = int_to_ptr.vmem [resolvable:$true] %s118_s14 }
  0x9f   :  { %s2230_s0 = scalar_lea.hbm %s2905_s6, 16 }
  0xa0   :  { %p2231_p2 = scmp.ne.s32.totalorder %s2905_s6, %s2230_s0  ;;  %p2234_p3 = scmp.lt.u32.totalorder %s2230_s0, %s2905_s6 }
  0xa2   :  { %p2236_p4 = pnand %p2234_p3, %p2231_p2 }
  0xa4   :  { %2239 = shalt.err (!%p2236_p4)
}
  0xa5   :  { %s2240_s4 = scalar_lea.vmem %s99_s9, 16  ;;  %s2244_s27 = scalar_lea.vmem %s99_s9, 32 }
  0xa6   :  { %p2241_p5 = scmp.ne.s32.totalorder %s99_s9, %s2240_s4  ;;  %p2245_p6 = scmp.lt.s32.totalorder %s99_s9, %s99_s9 }
  0xa7   :  { %p2246_p7 = scmp.lt.s32.totalorder %s2244_s27, %s2240_s4 }
  0xa9   :  { %p2247_p8 = por %p2246_p7, %p2245_p6 }
  0xab   :  { %p2248_p9 = pnand %p2247_p8, %p2241_p5 }
  0xad   :  { %2251 = shalt.err (!%p2248_p9)
}
  0xae   :  { %101 = dma.hbm_to_vmem [thread:$0]  %s2905_s6, 16, %s99_s9, [#allocation12]  }
  0xaf   :  { %s2252_s24 = scalar_lea.hbm %s2907_s8, 16 }
  0xb0   :  { %p2253_p10 = scmp.ne.s32.totalorder %s2907_s8, %s2252_s24  ;;  %p2256_p11 = scmp.lt.u32.totalorder %s2252_s24, %s2907_s8 }
  0xb2   :  { %p2258_p12 = pnand %p2256_p11, %p2253_p10 }
  0xb4   :  { %2261 = shalt.err (!%p2258_p12)
}
  0xb5   :  { %s2262_s5 = scalar_lea.vmem %s119_s14, 16  ;;  %s2266_s28 = scalar_lea.vmem %s119_s14, 32 }
  0xb6   :  { %p2263_p13 = scmp.ne.s32.totalorder %s119_s14, %s2262_s5  ;;  %p2267_p0 = scmp.lt.s32.totalorder %s119_s14, %s119_s14 }
  0xb7   :  { %p2268_p1 = scmp.lt.s32.totalorder %s2266_s28, %s2262_s5 }
  0xb9   :  { %p2269_p2 = por %p2268_p1, %p2267_p0 }
  0xbb   :  { %p2270_p3 = pnand %p2269_p2, %p2263_p13 }
  0xbd   :  { %2273 = shalt.err (!%p2270_p3)
}
  0xbe   :  { %121 = dma.hbm_to_vmem [thread:$0]  %s2907_s8, 16, %s119_s14, [#allocation15]  }
  0xbf   :  { %s2371_s29 = smov [#allocation19]   ;;  %s2372_s17 = smov [#allocation22]  }
  0xc0   :  { %s140_s16 = sshll.u32 %s2371_s29, 4  ;;  %s162_s0 = sshll.u32 %s2372_s17, 4  ;;  %s141_s16 = int_to_ptr.vmem [resolvable:$true] %s140_s16  ;;  %s163_s0 = int_to_ptr.vmem [resolvable:$true] %s162_s0 }
  0xc1   :  { %s2274_s20 = scalar_lea.hbm %s2909_s10, 16 }
  0xc2   :  { %p2275_p4 = scmp.ne.s32.totalorder %s2909_s10, %s2274_s20  ;;  %p2278_p5 = scmp.lt.u32.totalorder %s2274_s20, %s2909_s10 }
  0xc4   :  { %p2280_p6 = pnand %p2278_p5, %p2275_p4 }
  0xc6   :  { %2283 = shalt.err (!%p2280_p6)
}
  0xc7   :  { %s2284_s8 = scalar_lea.vmem %s141_s16, 16  ;;  %s2288_s14 = scalar_lea.vmem %s141_s16, 32 }
  0xc8   :  { %p2285_p7 = scmp.ne.s32.totalorder %s141_s16, %s2284_s8  ;;  %p2289_p8 = scmp.lt.s32.totalorder %s141_s16, %s141_s16 }
  0xc9   :  { %p2290_p9 = scmp.lt.s32.totalorder %s2288_s14, %s2284_s8 }
  0xcb   :  { %p2291_p10 = por %p2290_p9, %p2289_p8 }
  0xcd   :  { %p2292_p11 = pnand %p2291_p10, %p2285_p7 }
  0xcf   :  { %2295 = shalt.err (!%p2292_p11)
}
  0xd0   :  { %143 = dma.hbm_to_vmem [thread:$0]  %s2909_s10, 16, %s141_s16, [#allocation18]  }
  0xd1   :  { %s2296_s25 = scalar_lea.hbm %s2911_s12, 16 }
  0xd2   :  { %p2297_p12 = scmp.ne.s32.totalorder %s2911_s12, %s2296_s25  ;;  %p2300_p13 = scmp.lt.u32.totalorder %s2296_s25, %s2911_s12 }
  0xd4   :  { %p2302_p0 = pnand %p2300_p13, %p2297_p12 }
  0xd6   :  { %2305 = shalt.err (!%p2302_p0)
}
  0xd7   :  { %s2306_s28 = scalar_lea.vmem %s163_s0, 16  ;;  %s2310_s6 = scalar_lea.vmem %s163_s0, 32 }
  0xd8   :  { %p2307_p1 = scmp.ne.s32.totalorder %s163_s0, %s2306_s28  ;;  %p2311_p2 = scmp.lt.s32.totalorder %s163_s0, %s163_s0 }
  0xd9   :  { %p2312_p3 = scmp.lt.s32.totalorder %s2310_s6, %s2306_s28 }
  0xdb   :  { %p2313_p4 = por %p2312_p3, %p2311_p2 }
  0xdd   :  { %p2314_p5 = pnand %p2313_p4, %p2307_p1 }
  0xdf   :  { %2317 = shalt.err (!%p2314_p5)
}
  0xe0   :  { %165 = dma.hbm_to_vmem [thread:$0]  %s2911_s12, 16, %s163_s0, [#allocation21]  }
  0xe1   :  { %2340 = dma.done.wait [#allocation3], 256  }
  0xe2   :  { %2341 = vsyncadd [#allocation3], 4294967040 }
  0xe3   :  { %2342 = dma.done.wait [#allocation6], 32  }
  0xe4   :  { %2343 = vsyncadd [#allocation6], 4294967264 }
  0xe5   :  { %2344 = dma.done.wait [#allocation9], 272  }
  0xe6   :  { %2345 = vsyncadd [#allocation9], 4294967024 }
  0xe7   :  { %2346 = dma.done.wait [#allocation12], 272  }
  0xe8   :  { %2347 = vsyncadd [#allocation12], 4294967024 }
  0xe9   :  { %2348 = dma.done.wait [#allocation15], 32  }
  0xea   :  { %2349 = vsyncadd [#allocation15], 4294967264 }
  0xeb   :  { %2350 = dma.done.wait [#allocation18], 272  }
  0xec   :  { %2351 = vsyncadd [#allocation18], 4294967024 }
  0xed   :  { %2352 = dma.done.wait [#allocation21], 528  }
  0xee   :  { %2353 = vsyncadd [#allocation21], 4294966768  ;;  %vm210_vm0 = vcmask 261120   ;;  %v2635_v0 = vld [vmem:[#allocation2] sm:$0xff]  ;;  %v2637_v1 = vld [vmem:[#allocation2 + $0x8] sm:$0xff]  ;;  %v2373_v15 = vmov 0.0  }
  0xef   :  { %v211_v2 = vsel %vm210_vm0, %v2635_v0, 0.0  ;;  %v214_v3 = vsel %vm210_vm0, %v2637_v1, 0.0  ;;  %v1980_v14 = vld [vmem:[#allocation8] sm:$0xff]   ;;  %1793 = vmatprep.subr.bf16.mxu1 %v2373_v15  ;;  %1807 = vmatprep.subr.bf16.mxu0 %v2373_v15  ;;  %v1981_v16 = vld [vmem:[#allocation8 + $0x8] sm:$0xff]   ;;  %vm2374_vm1 = vmmov 0   ;;  %s2375_s12 = smov 112  }
  0xf0   :  { %212 = vadd.xlane.f32.xlu0 %v211_v2  ;;  %1794 = vmatpush3.bf16.msra.mxu1 %v1980_v14  ;;  %v1695_v25 = vld [vmem:[#allocation5] ss:$0 sm:$0xff]  ;;  %v1696_v29 = vld [vmem:[#allocation7] ss:$0 sm:$0xff]  ;;  %v1697_v34 = vld [vmem:[#allocation10] ss:$0 sm:$0xff] }
  0xf1   :  { %1797 = vmatprep.mubr.msk.bf16.mxu1 %vm2374_vm1, %v2373_v15  ;;  %1795 = vmatprep.subr.bf16.mxu1 %v2373_v15  ;;  %s2376_s29 = smov 120   ;;  %s2377_s16 = smov 104   ;;  %vm353_vm2 = vcmask 64512   ;;  %vm844_vm3 = vcmask 1043456   ;;  %vm1623_vm4 = vcmask 523264  }
  0xf2   :  { %1809 = vmatprep.mubr.msk.bf16.mxu0 %vm2374_vm1, %v2373_v15  ;;  %s2378_s17 = smov 96  }
  0xf4   :  { %215 = vadd.xlane.f32.xlu0 %v214_v3  ;;  %1796 = vmatpush3.bf16.msra.mxu1 %v1981_v16 }
  0xf5   :  { %1801 = vmatprep.subr.bf16.mxu1 %v2373_v15 }
 0x17d   :  { %v213_v4 = vpop.xlane.xlu0 %212 }
 0x17e   :  { %v218_v5 = vmul.f32 0.03125, %v213_v4 }
 0x180   :  { %v220_v6 = vsub.f32 %v2635_v0, %v218_v5 }
 0x181   :  { %v216_v7 = vpop.xlane.xlu0 %215 }
 0x182   :  { %v219_v8 = vmul.f32 0.03125, %v216_v7  ;;  %v222_v9 = vmul.f32 %v220_v6, %v220_v6 }
 0x184   :  { %v221_v10 = vsub.f32 %v2637_v1, %v219_v8  ;;  %v224_v11 = vsel %vm210_vm0, %v222_v9, 0.0 }
 0x185   :  { %225 = vadd.xlane.f32.xlu1 %v224_v11 }
 0x186   :  { %v223_v12 = vmul.f32 %v221_v10, %v221_v10 }
 0x188   :  { %v227_v13 = vsel %vm210_vm0, %v223_v12, 0.0 }
 0x189   :  { %228 = vadd.xlane.f32.xlu1 %v227_v13 }
 0x212   :  { %v226_v17 = vpop.xlane.xlu1 %225 }
 0x213   :  { %v230_v18 = vmul.f32 0.03125, %v226_v17 }
 0x215   :  { %v232_v19 = vadd.f32 1e-06, %v230_v18 }
 0x216   :  { %v229_v20 = vpop.xlane.xlu1 %228 }
 0x217   :  { %1988 = vrsqrt.f32 %v232_v19  ;;  %v231_v21 = vmul.f32 0.03125, %v229_v20 }
 0x219   :  { %v233_v22 = vadd.f32 1e-06, %v231_v21 }
 0x21b   :  { %1990 = vrsqrt.f32 %v233_v22 }
 0x221   :  { %v1989_v23 = vpop.eup %1988 }
 0x222   :  { %v236_v24 = vmul.f32 %v1989_v23, %v220_v6 }
 0x224   :  { %v244_v28 = vmul.f32 %v1695_v25, %v236_v24 }
 0x225   :  { %v1991_v26 = vpop.eup %1990 }
 0x226   :  { %v237_v27 = vmul.f32 %v1991_v26, %v221_v10  ;;  %v252_v31 = vadd.f32 %v1696_v29, %v244_v28 }
 0x228   :  { %v245_v30 = vmul.f32 %v1695_v25, %v237_v27 }
 0x22a   :  { %v253_v32 = vadd.f32 %v1696_v29, %v245_v30 }
 0x22c   :  { %v254_v33 = vpack.c.bf16 %v253_v32, %v252_v31 }
 0x22e   :  { %1798 = vmatmul.mubr.msk.bf16.vlgmr.msra.gmra.mrb[0].mxu1 %vm210_vm0, %v254_v33 }
 0x22f   :  { %1803 = vmatprep.mubr.msk.bf16.mxu1 %vm2374_vm1, %v2373_v15 }
 0x301   :  { %v315_v35 = vpop.f32.mrb[0].mxu1 }
 0x302   :  { %v1799_v36 = vpop.f32.mrb[1].mxu1  ;;  %v316_v38 = vadd.f32 %v1697_v34, %v315_v35 }
 0x303   :  { %v318_v37 = vpop.f32.mrb[2].mxu1 }
 0x304   :  { %v319_v39 = vadd.f32 %v1697_v34, %v318_v37  ;;  %v1800_v40 = vpop.f32.mrb[3].mxu1  ;;  %v342_v43 = vpack.c.bf16 %v316_v38, %v316_v38 }
 0x306   :  { %v1970_v41 = vpack.i.bf16 %v319_v39, %v316_v38  ;;  %v2658_v42 = vpack.c.bf16 %v319_v39, %v319_v39 }
 0x308   :  { %1971 = vrot.lane.b32.xlu1 %v1970_v41, %s2375_s12  ;;  %1966 = vrot.lane.b32.xlu0 %v1970_v41, %s2376_s29 }
 0x30c   :  { %1976 = vrot.lane.b32.xlu1 %v1970_v41, %s2377_s16  ;;  %401 = vrot.lane.b32.xlu0 %v2658_v42, %s2378_s17 }
 0x310   :  { %351 = vrot.lane.b32.xlu1 %v342_v43, %s2378_s17 }
 0x37a   :  { %v1972_v44 = vpop.permute.xlu1 %1971  ;;  %v1967_v45 = vpop.permute.xlu0 %1966 }
 0x37b   :  { %v1969_v46 = vunpack.i.h.bf16 %v1967_v45  ;;  %v1968_v47 = vunpack.i.l.bf16 %v1967_v45  ;;  %v1974_v48 = vunpack.i.h.bf16 %v1972_v44  ;;  %v1973_v49 = vunpack.i.l.bf16 %v1972_v44 }
 0x37d   :  { %v2663_v50 = vpack.c.bf16 %v1969_v46, %v1969_v46  ;;  %v2665_v51 = vpack.c.bf16 %v1968_v47, %v1968_v47  ;;  %v2672_v55 = vpack.c.bf16 %v1974_v48, %v1974_v48  ;;  %v2674_v56 = vpack.c.bf16 %v1973_v49, %v1973_v49 }
 0x37e   :  { %v1977_v52 = vpop.permute.xlu1 %1976  ;;  %v402_v53 = vpop.permute.xlu0 %401 }
 0x37f   :  { %450 = vrot.lane.b32.xlu1 %v2665_v51, %s2378_s17  ;;  %499 = vrot.lane.b32.xlu0 %v2663_v50, %s2378_s17  ;;  %v407_v54 = vsel %vm353_vm2, %v402_v53, 0  ;;  %v1979_v57 = vunpack.i.h.bf16 %v1977_v52  ;;  %v1978_v58 = vunpack.i.l.bf16 %v1977_v52 }
 0x380   :  { %1808 = vmatpush3.bf16.xpose.msra.mxu0 %v407_v54 }
 0x381   :  { %1819 = vmatprep.subr.bf16.mxu0 %v2373_v15  ;;  %v2682_v61 = vpack.c.bf16 %v1979_v57, %v1979_v57  ;;  %v2684_v62 = vpack.c.bf16 %v1978_v58, %v1978_v58 }
 0x382   :  { %v352_v59 = vpop.permute.xlu1 %351 }
 0x383   :  { %v358_v60 = vsel %vm353_vm2, %v352_v59, 0  ;;  %548 = vrot.lane.b32.xlu1 %v2674_v56, %s2378_s17  ;;  %597 = vrot.lane.b32.xlu0 %v2672_v55, %s2378_s17 }
 0x384   :  { %1802 = vmatpush3.bf16.xpose.msra.mxu1 %v358_v60 }
 0x385   :  { %1813 = vmatprep.subr.bf16.mxu1 %v2373_v15 }
 0x387   :  { %646 = vrot.lane.b32.xlu1 %v2684_v62, %s2378_s17  ;;  %695 = vrot.lane.b32.xlu0 %v2682_v61, %s2378_s17 }
 0x388   :  { %1810 = vmatmul.mubr.msk.bf16.vlgmr.msra.gmra.mrb[0].mxu0 %vm353_vm2, %v2658_v42 }
 0x389   :  { %1821 = vmatprep.mubr.msk.bf16.mxu0 %vm2374_vm1, %v2373_v15 }
 0x38b   :  { %1804 = vmatmul.mubr.msk.bf16.vlgmr.msra.gmra.mrb[4].mxu1 %vm353_vm2, %v342_v43  ;;  %839 = vrot.lane.b32.xlu1 %v342_v43, %s2358_s1 }
 0x38c   :  { %1815 = vmatprep.mubr.msk.bf16.mxu1 %vm2374_vm1, %v2373_v15 }
 0x3f1   :  { %v451_v63 = vpop.permute.xlu1 %450  ;;  %v500_v2 = vpop.permute.xlu0 %499 }
 0x3f2   :  { %v456_v3 = vsel %vm353_vm2, %v451_v63, 0  ;;  %v505_v4 = vsel %vm353_vm2, %v500_v2, 0 }
 0x3f3   :  { %1814 = vmatpush3.bf16.xpose.msra.mxu1 %v456_v3  ;;  %1820 = vmatpush3.bf16.xpose.msra.mxu0 %v505_v4 }
 0x3f4   :  { %1825 = vmatprep.subr.bf16.mxu1 %v2373_v15  ;;  %1831 = vmatprep.subr.bf16.mxu0 %v2373_v15 }
 0x3f5   :  { %v549_v5 = vpop.permute.xlu1 %548  ;;  %v598_v6 = vpop.permute.xlu0 %597 }
 0x3f6   :  { %v554_v7 = vsel %vm353_vm2, %v549_v5, 0  ;;  %v603_v8 = vsel %vm353_vm2, %v598_v6, 0 }
 0x3f9   :  { %v647_v9 = vpop.permute.xlu1 %646  ;;  %v696_v10 = vpop.permute.xlu0 %695 }
 0x3fa   :  { %1816 = vmatmul.mubr.msk.bf16.vlgmr.msra.gmra.mrb[8].mxu1 %vm353_vm2, %v2665_v51  ;;  %1822 = vmatmul.mubr.msk.bf16.vlgmr.msra.gmra.mrb[4].mxu0 %vm353_vm2, %v2663_v50  ;;  %v652_v11 = vsel %vm353_vm2, %v647_v9, 0  ;;  %v701_v12 = vsel %vm353_vm2, %v696_v10, 0 }
 0x3fb   :  { %1826 = vmatpush3.bf16.xpose.msra.mxu1 %v554_v7  ;;  %1832 = vmatpush3.bf16.xpose.msra.mxu0 %v603_v8 }
 0x3fc   :  { %1827 = vmatprep.mubr.msk.bf16.mxu1 %vm2374_vm1, %v2373_v15  ;;  %1833 = vmatprep.mubr.msk.bf16.mxu0 %vm2374_vm1, %v2373_v15 }
 0x3fd   :  { %1837 = vmatprep.subr.bf16.mxu1 %v2373_v15  ;;  %1843 = vmatprep.subr.bf16.mxu0 %v2373_v15  ;;  %v840_v13 = vpop.permute.xlu1 %839 }
 0x3fe   :  { %v846_v14 = vsel %vm844_vm3, %v840_v13, 0 }
 0x402   :  { %1828 = vmatmul.mubr.msk.bf16.vlgmr.msra.gmra.mrb[12].mxu1 %vm353_vm2, %v2674_v56  ;;  %1834 = vmatmul.mubr.msk.bf16.vlgmr.msra.gmra.mrb[8].mxu0 %vm353_vm2, %v2672_v55 }
 0x403   :  { %1838 = vmatpush3.bf16.xpose.msra.mxu1 %v652_v11  ;;  %1844 = vmatpush3.bf16.xpose.msra.mxu0 %v701_v12 }
 0x404   :  { %1839 = vmatprep.mubr.msk.bf16.mxu1 %vm2374_vm1, %v2373_v15  ;;  %1845 = vmatprep.mubr.msk.bf16.mxu0 %vm2374_vm1, %v2373_v15 }
 0x405   :  { %1849 = vmatprep.subr.bf16.mxu1 %v2373_v15  ;;  %1855 = vmatprep.subr.bf16.mxu0 %v2373_v15 }
 0x40a   :  { %1840 = vmatmul.mubr.msk.bf16.vlgmr.msra.gmra.mrb[16].mxu1 %vm353_vm2, %v2684_v62  ;;  %1846 = vmatmul.mubr.msk.bf16.vlgmr.msra.gmra.mrb[12].mxu0 %vm353_vm2, %v2682_v61 }
 0x40b   :  { %1850 = vmatpush3.bf16.msra.mxu1 %v846_v14  ;;  %1857 = vmatprep.mubr.msk.bf16.mxu0 %vm2374_vm1, %v2373_v15 }
 0x40c   :  { %1851 = vmatprep.mubr.msk.bf16.mxu1 %vm2374_vm1, %v2373_v15  ;;  %1861 = vmatprep.subr.bf16.mxu1 %v2373_v15 }
 0x45b   :  { %v443_v16 = vpop.f32.mrb[0].mxu0 }
 0x45c   :  { %v1811_v17 = vpop.f32.mrb[1].mxu0  ;;  %v746_v18 = vsel %vm353_vm2, %v443_v16, -inf }
 0x45d   :  { %747 = vmax.xlane.f32.xlu0 %v746_v18  ;;  %v446_v19 = vpop.f32.mrb[2].mxu0 }
 0x45e   :  { %v1812_v20 = vpop.f32.mrb[3].mxu0  ;;  %v394_v21 = vpop.f32.mrb[4].mxu1 }
 0x45f   :  { %v1805_v22 = vpop.f32.mrb[5].mxu1  ;;  %v743_v23 = vsel %vm353_vm2, %v394_v21, -inf }
 0x460   :  { %744 = vmax.xlane.f32.xlu1 %v743_v23  ;;  %v397_v24 = vpop.f32.mrb[6].mxu1 }
 0x461   :  { %v1806_v25 = vpop.f32.mrb[7].mxu1 }
 0x4cd   :  { %v492_v26 = vpop.f32.mrb[8].mxu1  ;;  %v541_v27 = vpop.f32.mrb[4].mxu0 }
 0x4ce   :  { %v1817_v28 = vpop.f32.mrb[9].mxu1  ;;  %v1823_v29 = vpop.f32.mrb[5].mxu0  ;;  %v749_v30 = vsel %vm353_vm2, %v492_v26, -inf  ;;  %v752_v35 = vsel %vm353_vm2, %v541_v27, -inf }
 0x4cf   :  { %v544_v31 = vpop.f32.mrb[6].mxu0  ;;  %750 = vmax.xlane.f32.xlu0 %v749_v30  ;;  %v495_v32 = vpop.f32.mrb[10].mxu1 }
 0x4d0   :  { %v1818_v33 = vpop.f32.mrb[11].mxu1  ;;  %v1824_v34 = vpop.f32.mrb[7].mxu0 }
 0x4d3   :  { %753 = vmax.xlane.f32.xlu0 %v752_v35 }
 0x4d5   :  { %v590_v36 = vpop.f32.mrb[12].mxu1  ;;  %v2741_v37 = vpop.f32.mrb[8].mxu0 }
 0x4d6   :  { %v1829_v38 = vpop.f32.mrb[13].mxu1  ;;  %v1835_v39 = vpop.f32.mrb[9].mxu0  ;;  %v758_v40 = vsel %vm353_vm2, %v2741_v37, -inf  ;;  %v755_v41 = vsel %vm353_vm2, %v590_v36, -inf }
 0x4d7   :  { %v642_v43 = vpop.f32.mrb[10].mxu0  ;;  %759 = vmax.xlane.f32.xlu0 %v758_v40  ;;  %756 = vmax.xlane.f32.xlu1 %v755_v41  ;;  %v593_v44 = vpop.f32.mrb[14].mxu1 }
 0x4d8   :  { %v1830_v45 = vpop.f32.mrb[15].mxu1  ;;  %v1836_v46 = vpop.f32.mrb[11].mxu0 }
 0x4dd   :  { %v688_v47 = vpop.f32.mrb[16].mxu1  ;;  %v2746_v48 = vpop.f32.mrb[12].mxu0 }
 0x4de   :  { %v1841_v49 = vpop.f32.mrb[17].mxu1  ;;  %v1847_v52 = vpop.f32.mrb[13].mxu0  ;;  %v764_v53 = vsel %vm353_vm2, %v2746_v48, -inf  ;;  %v761_v54 = vsel %vm353_vm2, %v688_v47, -inf }
 0x4df   :  { %v740_v57 = vpop.f32.mrb[14].mxu0  ;;  %765 = vmax.xlane.f32.xlu0 %v764_v53  ;;  %762 = vmax.xlane.f32.xlu1 %v761_v54  ;;  %v691_v58 = vpop.f32.mrb[18].mxu1 }
 0x4e0   :  { %v1842_v59 = vpop.f32.mrb[19].mxu1  ;;  %v1848_v60 = vpop.f32.mrb[15].mxu0 }
 0x4ea   :  { %v748_v63 = vpop.xlane.xlu0 %747 }
 0x4eb   :  { %v768_v2 = vsub.f32 %v443_v16, %v748_v63 }
 0x4ed   :  { %v745_v3 = vpop.xlane.xlu1 %744  ;;  %v777_v4 = vmul.f32 1.442695, %v768_v2 }
 0x4ee   :  { %v767_v5 = vsub.f32 %v394_v21, %v745_v3 }
 0x4ef   :  { %1992 = vpow2.f32 %v777_v4 }
 0x4f0   :  { %936 = vrot.lane.b32.xlu1 %v2665_v51, %s2358_s1  ;;  %v775_v6 = vmul.f32 1.442695, %v767_v5 }
 0x4f2   :  { %1994 = vpow2.f32 %v775_v6 }
 0x4f4   :  { %984 = vrot.lane.b32.xlu1 %v2663_v50, %s2358_s1 }
 0x4f5   :  { %888 = vrot.lane.b32.xlu0 %v2658_v42, %s2358_s1 }
 0x4f9   :  { %v1993_v7 = vpop.eup %1992 }
 0x4fa   :  { %v794_v8 = vsel %vm353_vm2, %v1993_v7, 0.0 }
 0x4fc   :  { %v2758_v9 = vpop.eup %1994 }
 0x4fd   :  { %v791_v50 = vsel %vm353_vm2, %v2758_v9, 0.0 }
 0x514   :  { %795 = vadd.xlane.f32.xlu0 %v794_v8 }
 0x518   :  { %792 = vadd.xlane.f32.xlu1 %v791_v50 }
 0x529   :  { %1032 = vrot.lane.b32.xlu1 %v2674_v56, %s2358_s1 }
 0x55c   :  { %v751_v42 = vpop.xlane.xlu0 %750 }
 0x55d   :  { %v769_v51 = vsub.f32 %v492_v26, %v751_v42 }
 0x55f   :  { %v779_v10 = vmul.f32 1.442695, %v769_v51 }
 0x560   :  { %v754_v11 = vpop.xlane.xlu0 %753 }
 0x561   :  { %1996 = vpow2.f32 %v779_v10  ;;  %v770_v12 = vsub.f32 %v541_v27, %v754_v11  ;;  %v1224_v11 = vld [vmem:[#allocation11] sm:$0xf] }
 0x563   :  { %v781_v13 = vmul.f32 1.442695, %v770_v12 }
 0x564   :  { %v757_v14 = vpop.xlane.xlu1 %756  ;;  %v760_v18 = vpop.xlane.xlu0 %759 }
 0x565   :  { %1998 = vpow2.f32 %v781_v13  ;;  %v771_v16 = vsub.f32 %v590_v36, %v757_v14  ;;  %v772_v32 = vsub.f32 %v2741_v37, %v760_v18  ;;  %v1252_v14 = vsel %vm844_vm3, %v1224_v11, 0 }
 0x567   :  { %v783_v17 = vmul.f32 1.442695, %v771_v16  ;;  %v785_v33 = vmul.f32 1.442695, %v772_v32 }
 0x569   :  { %2000 = vpow2.f32 %v783_v17 }
 0x56b   :  { %v2764_v19 = vpop.eup %1996 }
 0x56c   :  { %v766_v20 = vpop.xlane.xlu0 %765  ;;  %v763_v21 = vpop.xlane.xlu1 %762  ;;  %v797_v56 = vsel %vm353_vm2, %v2764_v19, 0.0 }
 0x56d   :  { %v773_v22 = vsub.f32 %v688_v47, %v763_v21  ;;  %798 = vadd.xlane.f32.xlu1 %v797_v56  ;;  %v774_v34 = vsub.f32 %v2746_v48, %v766_v20 }
 0x56f   :  { %v2768_v23 = vpop.eup %1998  ;;  %v787_v24 = vmul.f32 1.442695, %v773_v22  ;;  %v789_v35 = vmul.f32 1.442695, %v774_v34 }
 0x570   :  { %v889_v25 = vpop.permute.xlu0 %888  ;;  %v800_v26 = vsel %vm353_vm2, %v2768_v23, 0.0  ;;  %v937_v36 = vpop.permute.xlu1 %936 }
 0x571   :  { %v894_v27 = vsel %vm844_vm3, %v889_v25, 0  ;;  %801 = vadd.xlane.f32.xlu0 %v800_v26  ;;  %2002 = vpow2.f32 %v787_v24  ;;  %v942_v52 = vsel %vm844_vm3, %v937_v36, 0  ;;  %v1225_v25 = vld [vmem:[#allocation11 + $0x4] sm:$0xf]  ;;  %v1226_v36 = vld [vmem:[#allocation11 + $0x8] sm:$0xf] }
 0x572   :  { %1856 = vmatpush3.bf16.msra.mxu0 %v894_v27  ;;  %2004 = vpow2.f32 %v785_v33  ;;  %v1306_v26 = vsel %vm844_vm3, %v1225_v25, 0 }
 0x573   :  { %1867 = vmatprep.subr.bf16.mxu0 %v2373_v15  ;;  %v2774_v28 = vpop.eup %2000  ;;  %2006 = vpow2.f32 %v789_v35 }
 0x574   :  { %v803_v29 = vsel %vm353_vm2, %v2774_v28, 0.0  ;;  %v985_v38 = vpop.permute.xlu1 %984 }
 0x575   :  { %804 = vadd.xlane.f32.xlu1 %v803_v29  ;;  %v990_v47 = vsel %vm844_vm3, %v985_v38, 0  ;;  %v1360_v38 = vsel %vm844_vm3, %v1226_v36, 0 }
 0x57b   :  { %v2778_v30 = vpop.eup %2002 }
 0x57c   :  { %v809_v31 = vsel %vm353_vm2, %v2778_v30, 0.0  ;;  %v2788_v40 = vpop.eup %2004 }
 0x57d   :  { %810 = vadd.xlane.f32.xlu1 %v809_v31  ;;  %v2792_v43 = vpop.eup %2006 }
 0x587   :  { %1080 = vrot.lane.b32.xlu0 %v2672_v55, %s2358_s1  ;;  %v806_v55 = vsel %vm353_vm2, %v2788_v40, 0.0 }
 0x58e   :  { %1128 = vrot.lane.b32.xlu1 %v2684_v62, %s2358_s1  ;;  %v812_v62 = vsel %vm353_vm2, %v2792_v43, 0.0 }
 0x5a1   :  { %v796_v39 = vpop.xlane.xlu0 %795 }
 0x5a2   :  { %2008 = vrcp.f32 %v796_v39 }
 0x5a5   :  { %v793_v41 = vpop.xlane.xlu1 %792 }
 0x5a6   :  { %2010 = vrcp.f32 %v793_v41  ;;  %807 = vadd.xlane.f32.xlu0 %v806_v55  ;;  %v1227_v55 = vld [vmem:[#allocation11 + $0xc] sm:$0xf] }
 0x5a9   :  { %v1033_v53 = vpop.permute.xlu1 %1032 }
 0x5aa   :  { %813 = vadd.xlane.f32.xlu0 %v812_v62  ;;  %v1038_v3 = vsel %vm844_vm3, %v1033_v53, 0 }
 0x5ac   :  { %v2009_v37 = vpop.eup %2008 }
 0x5ad   :  { %v824_v44 = vmul.f32 %v2009_v37, %v1993_v7 }
 0x5af   :  { %v832_v45 = vpack.c.bf16 %v824_v44, %v824_v44 }
 0x5b0   :  { %v2011_v46 = vpop.eup %2010 }
 0x5b1   :  { %v823_v48 = vmul.f32 %v2011_v46, %v2758_v9  ;;  %1858 = vmatmul.mubr.msk.bf16.vlgmr.msra.gmra.mrb[16].mxu0 %vm353_vm2, %v832_v45  ;;  %v1414_v45 = vsel %vm844_vm3, %v1227_v55, 0 }
 0x5b2   :  { %1868 = vmatpush3.bf16.msra.mxu0 %v990_v47  ;;  %1869 = vmatprep.mubr.msk.bf16.mxu0 %vm2374_vm1, %v2373_v15 }
 0x5b3   :  { %v831_v49 = vpack.c.bf16 %v823_v48, %v823_v48  ;;  %1879 = vmatprep.subr.bf16.mxu0 %v2373_v15 }
 0x5b5   :  { %1852 = vmatmul.mubr.msk.bf16.vlgmr.msra.gmra.mrb[20].mxu1 %vm353_vm2, %v831_v49 }
 0x5b6   :  { %1862 = vmatpush3.bf16.msra.mxu1 %v942_v52  ;;  %1863 = vmatprep.mubr.msk.bf16.mxu1 %vm2374_vm1, %v2373_v15 }
 0x5b7   :  { %1873 = vmatprep.subr.bf16.mxu1 %v2373_v15 }
 0x5c0   :  { %1176 = vrot.lane.b32.xlu0 %v2682_v61, %s2358_s1  ;;  %s2379_s1 = smov [#allocation23]  }
 0x5c1   :  { %s1677_s0 = sshll.u32 %s2379_s1, 4  ;;  %s1678_s0 = int_to_ptr.vmem [resolvable:$true] %s1677_s0 }
 0x5c2   :  { %s2318_s15 = scalar_lea.vmem %s1678_s0, 256  ;;  %p2323_p7 = scmp.lt.s32.totalorder %s1678_s0, %s1678_s0 }
 0x5c3   :  { %p2319_p6 = scmp.ne.s32.totalorder %s1678_s0, %s2318_s15  ;;  %p2324_p8 = scmp.lt.s32.totalorder %s2318_s15, %s2318_s15 }
 0x5c5   :  { %p2325_p9 = por %p2324_p8, %p2323_p7 }
 0x5c7   :  { %p2326_p10 = pnand %p2325_p9, %p2319_p6 }
 0x5fa   :  { %v799_v54 = vpop.xlane.xlu1 %798 }
 0x5fb   :  { %2012 = vrcp.f32 %v799_v54 }
 0x5fe   :  { %v802_v57 = vpop.xlane.xlu0 %801 }
 0x5ff   :  { %2014 = vrcp.f32 %v802_v57 }
 0x602   :  { %v805_v58 = vpop.xlane.xlu1 %804  ;;  %v1081_v5 = vpop.permute.xlu0 %1080 }
 0x603   :  { %2016 = vrcp.f32 %v805_v58  ;;  %v1086_v8 = vsel %vm844_vm3, %v1081_v5, 0 }
 0x605   :  { %v2013_v59 = vpop.eup %2012 }
 0x606   :  { %v825_v60 = vmul.f32 %v2013_v59, %v2764_v19 }
 0x608   :  { %v833_v63 = vpack.c.bf16 %v825_v60, %v825_v60 }
 0x609   :  { %v2015_v2 = vpop.eup %2014 }
 0x60a   :  { %v826_v4 = vmul.f32 %v2015_v2, %v2768_v23  ;;  %1864 = vmatmul.mubr.msk.bf16.vlgmr.msra.gmra.mrb[24].mxu1 %vm353_vm2, %v833_v63  ;;  %v811_v61 = vpop.xlane.xlu1 %810 }
 0x60b   :  { %1874 = vmatpush3.bf16.msra.mxu1 %v1038_v3  ;;  %1875 = vmatprep.mubr.msk.bf16.mxu1 %vm2374_vm1, %v2373_v15  ;;  %2018 = vrcp.f32 %v811_v61 }
 0x60c   :  { %v834_v6 = vpack.c.bf16 %v826_v4, %v826_v4  ;;  %1885 = vmatprep.subr.bf16.mxu1 %v2373_v15 }
 0x60d   :  { %v2017_v7 = vpop.eup %2016 }
 0x60e   :  { %1870 = vmatmul.mubr.msk.bf16.vlgmr.msra.gmra.mrb[20].mxu0 %vm353_vm2, %v834_v6  ;;  %v827_v9 = vmul.f32 %v2017_v7, %v2774_v28  ;;  %v1129_v50 = vpop.permute.xlu1 %1128 }
 0x60f   :  { %1880 = vmatpush3.bf16.msra.mxu0 %v1086_v8  ;;  %1881 = vmatprep.mubr.msk.bf16.mxu0 %vm2374_vm1, %v2373_v15  ;;  %v1134_v51 = vsel %vm844_vm3, %v1129_v50, 0 }
 0x610   :  { %1891 = vmatprep.subr.bf16.mxu0 %v2373_v15  ;;  %v835_v42 = vpack.c.bf16 %v827_v9, %v827_v9 }
 0x612   :  { %1876 = vmatmul.mubr.msk.bf16.vlgmr.msra.gmra.mrb[28].mxu1 %vm353_vm2, %v835_v42 }
 0x613   :  { %1886 = vmatpush3.bf16.msra.mxu1 %v1134_v51  ;;  %1887 = vmatprep.mubr.msk.bf16.mxu1 %vm2374_vm1, %v2373_v15 }
 0x614   :  { %1897 = vmatprep.subr.bf16.mxu1 %v2373_v15 }
 0x615   :  { %v2019_v10 = vpop.eup %2018 }
 0x616   :  { %v829_v12 = vmul.f32 %v2019_v10, %v2778_v30  ;;  %v1717_v10 = vld [vmem:[#allocation13] ss:$0 sm:$0xff] }
 0x618   :  { %v837_v13 = vpack.c.bf16 %v829_v12, %v829_v12 }
 0x61a   :  { %1888 = vmatmul.mubr.msk.bf16.vlgmr.msra.gmra.mrb[32].mxu1 %vm353_vm2, %v837_v13 }
 0x61b   :  { %1898 = vmatpush3.bf16.msra.mxu1 %v1252_v14  ;;  %1899 = vmatprep.mubr.msk.bf16.mxu1 %vm2374_vm1, %v2373_v15 }
 0x61c   :  { %1909 = vmatprep.subr.bf16.mxu1 %v2373_v15 }
 0x633   :  { %v808_v16 = vpop.xlane.xlu0 %807 }
 0x634   :  { %2020 = vrcp.f32 %v808_v16 }
 0x637   :  { %v814_v17 = vpop.xlane.xlu0 %813 }
 0x638   :  { %2022 = vrcp.f32 %v814_v17 }
 0x63b   :  { %v1177_v20 = vpop.permute.xlu0 %1176 }
 0x63c   :  { %v1182_v22 = vsel %vm844_vm3, %v1177_v20, 0 }
 0x63e   :  { %v2021_v18 = vpop.eup %2020 }
 0x63f   :  { %v828_v19 = vmul.f32 %v2021_v18, %v2788_v40 }
 0x641   :  { %v836_v21 = vpack.c.bf16 %v828_v19, %v828_v19 }
 0x642   :  { %v2023_v56 = vpop.eup %2022 }
 0x643   :  { %1882 = vmatmul.mubr.msk.bf16.vlgmr.msra.gmra.mrb[24].mxu0 %vm353_vm2, %v836_v21  ;;  %v830_v23 = vmul.f32 %v2023_v56, %v2792_v43 }
 0x644   :  { %1892 = vmatpush3.bf16.msra.mxu0 %v1182_v22  ;;  %1893 = vmatprep.mubr.msk.bf16.mxu0 %vm2374_vm1, %v2373_v15 }
 0x645   :  { %1903 = vmatprep.subr.bf16.mxu0 %v2373_v15  ;;  %v838_v24 = vpack.c.bf16 %v830_v23, %v830_v23 }
 0x64b   :  { %1894 = vmatmul.mubr.msk.bf16.vlgmr.msra.gmra.mrb[28].mxu0 %vm353_vm2, %v838_v24 }
 0x64c   :  { %1905 = vmatprep.mubr.msk.bf16.mxu0 %vm2374_vm1, %v2373_v15  ;;  %1904 = vmatpush3.bf16.msra.mxu0 %v1306_v26 }
 0x64d   :  { %1915 = vmatprep.subr.bf16.mxu0 %v2373_v15 }
 0x684   :  { %v930_v27 = vpop.f32.mrb[16].mxu0 }
 0x685   :  { %v1859_v28 = vpop.f32.mrb[17].mxu0 }
 0x686   :  { %v933_v29 = vpop.f32.mrb[18].mxu0 }
 0x687   :  { %v1860_v30 = vpop.f32.mrb[19].mxu0 }
 0x688   :  { %v882_v31 = vpop.f32.mrb[20].mxu1 }
 0x689   :  { %v1738_v32 = vpack.c.bf16 %v930_v27, %v882_v31  ;;  %v1853_v33 = vpop.f32.mrb[21].mxu1 }
 0x68a   :  { %v885_v34 = vpop.f32.mrb[22].mxu1 }
 0x68b   :  { %v1854_v35 = vpop.f32.mrb[23].mxu1  ;;  %1900 = vmatmul.mubr.msk.bf16.vlgmr.msra.gmra.mrb[36].mxu1 %vm353_vm2, %v1738_v32 }
 0x68c   :  { %1911 = vmatprep.mubr.msk.bf16.mxu1 %vm2374_vm1, %v2373_v15  ;;  %1910 = vmatpush3.bf16.msra.mxu1 %v1360_v38 }
 0x68d   :  { %1921 = vmatprep.subr.bf16.mxu1 %v2373_v15 }
 0x6dd   :  { %v978_v39 = vpop.f32.mrb[24].mxu1 }
 0x6de   :  { %v1865_v40 = vpop.f32.mrb[25].mxu1 }
 0x6df   :  { %v981_v41 = vpop.f32.mrb[26].mxu1 }
 0x6e0   :  { %v1866_v43 = vpop.f32.mrb[27].mxu1 }
 0x6e1   :  { %v1026_v62 = vpop.f32.mrb[20].mxu0 }
 0x6e2   :  { %v1739_v37 = vpack.c.bf16 %v1026_v62, %v978_v39  ;;  %v1871_v44 = vpop.f32.mrb[21].mxu0  ;;  %v1982_v62 = vld [vmem:[#allocation17] sm:$0xff]  }
 0x6e3   :  { %v1029_v46 = vpop.f32.mrb[22].mxu0 }
 0x6e4   :  { %v1872_v47 = vpop.f32.mrb[23].mxu0  ;;  %1906 = vmatmul.mubr.msk.bf16.vlgmr.msra.gmra.mrb[32].mxu0 %vm353_vm2, %v1739_v37  ;;  %v1983_v37 = vld [vmem:[#allocation17 + $0x8] sm:$0xff]  }
 0x6e5   :  { %1916 = vmatpush3.bf16.msra.mxu0 %v1414_v45  ;;  %1917 = vmatprep.mubr.msk.bf16.mxu0 %vm2374_vm1, %v2373_v15  ;;  %v1074_v48 = vpop.f32.mrb[28].mxu1 }
 0x6e6   :  { %1929 = vmatprep.subr.bf16.mxu0 %v2373_v15  ;;  %v1877_v49 = vpop.f32.mrb[29].mxu1 }
 0x6e7   :  { %v1077_v52 = vpop.f32.mrb[30].mxu1 }
 0x6e8   :  { %v1878_v53 = vpop.f32.mrb[31].mxu1 }
 0x6ed   :  { %v1170_v54 = vpop.f32.mrb[32].mxu1 }
 0x6ee   :  { %v1889_v57 = vpop.f32.mrb[33].mxu1 }
 0x6ef   :  { %v1173_v58 = vpop.f32.mrb[34].mxu1 }
 0x6f0   :  { %v1890_v59 = vpop.f32.mrb[35].mxu1 }
 0x716   :  { %v1122_v60 = vpop.f32.mrb[24].mxu0 }
 0x717   :  { %v1740_v63 = vpack.c.bf16 %v1122_v60, %v1074_v48  ;;  %v1883_v2 = vpop.f32.mrb[25].mxu0  ;;  %v1727_v60 = vld [vmem:[#allocation16] ss:$0 sm:$0xff] }
 0x718   :  { %v1125_v3 = vpop.f32.mrb[26].mxu0 }
 0x719   :  { %v1884_v4 = vpop.f32.mrb[27].mxu0  ;;  %1912 = vmatmul.mubr.msk.bf16.vlgmr.msra.gmra.mrb[40].mxu1 %vm353_vm2, %v1740_v63 }
 0x71a   :  { %1925 = vmatprep.mubr.msk.bf16.mxu1 %vm2374_vm1, %v2373_v15  ;;  %1922 = vmatpush3.bf16.msra.mxu1 %v1982_v62 }
 0x71b   :  { %1923 = vmatprep.subr.bf16.mxu1 %v2373_v15 }
 0x71e   :  { %v1218_v5 = vpop.f32.mrb[28].mxu0  ;;  %1924 = vmatpush3.bf16.msra.mxu1 %v1983_v37 }
 0x71f   :  { %v1741_v61 = vpack.c.bf16 %v1218_v5, %v1170_v54  ;;  %v1895_v6 = vpop.f32.mrb[29].mxu0  ;;  %v1726_v54 = vld [vmem:[#allocation14] ss:$0 sm:$0xff]  ;;  %v1984_v5 = vld [vmem:[#allocation20] sm:$0xff]  }
 0x720   :  { %v1221_v7 = vpop.f32.mrb[30].mxu0  ;;  %v1986_v6 = vld [vmem:[#allocation20 + $0x10] sm:$0xff]  }
 0x721   :  { %v1896_v8 = vpop.f32.mrb[31].mxu0  ;;  %1918 = vmatmul.mubr.msk.bf16.vlgmr.msra.gmra.mrb[36].mxu0 %vm353_vm2, %v1741_v61  ;;  %v1985_v61 = vld [vmem:[#allocation20 + $0x8] sm:$0xff]   ;;  %v1987_v7 = vld [vmem:[#allocation20 + $0x18] sm:$0xff]  }
 0x722   :  { %1937 = vmatprep.mubr.msk.bf16.mxu0 %vm2374_vm1, %v2373_v15  ;;  %1930 = vmatpush3.bf16.msra.mxu0 %v1984_v5  ;;  %v1728_v8 = vld [vmem:[#allocation19] ss:$0 sm:$0xff] }
 0x723   :  { %1931 = vmatprep.subr.bf16.mxu0 %v2373_v15 }
 0x726   :  { %1932 = vmatpush3.bf16.msra.mxu0 %v1985_v61 }
 0x727   :  { %1933 = vmatprep.subr.bf16.mxu0 %v2373_v15 }
 0x72a   :  { %1934 = vmatpush3.bf16.msra.mxu0 %v1986_v6 }
 0x72b   :  { %1935 = vmatprep.subr.bf16.mxu0 %v2373_v15 }
 0x72e   :  { %1936 = vmatpush3.bf16.msra.mxu0 %v1987_v7 }
 0x75e   :  { %v1288_v9 = vpop.f32.mrb[36].mxu1 }
 0x75f   :  { %v1901_v50 = vpop.f32.mrb[37].mxu1  ;;  %v1295_v11 = vadd.f32 %v1717_v10, %v1288_v9 }
 0x760   :  { %v1291_v42 = vpop.f32.mrb[38].mxu1 }
 0x761   :  { %v1902_v51 = vpop.f32.mrb[39].mxu1  ;;  %v1296_v13 = vadd.f32 %v1717_v10, %v1291_v42 }
 0x7b7   :  { %v1342_v12 = vpop.f32.mrb[32].mxu0 }
 0x7b8   :  { %v1349_v14 = vadd.f32 %v1342_v12, %v1295_v11  ;;  %v1907_v16 = vpop.f32.mrb[33].mxu0 }
 0x7b9   :  { %v1345_v17 = vpop.f32.mrb[34].mxu0 }
 0x7ba   :  { %v1350_v18 = vadd.f32 %v1345_v17, %v1296_v13  ;;  %v1908_v19 = vpop.f32.mrb[35].mxu0 }
 0x7ec   :  { %v1396_v20 = vpop.f32.mrb[40].mxu1 }
 0x7ed   :  { %v1403_v21 = vadd.f32 %v1396_v20, %v1349_v14  ;;  %v1913_v56 = vpop.f32.mrb[41].mxu1 }
 0x7ee   :  { %v1399_v22 = vpop.f32.mrb[42].mxu1 }
 0x7ef   :  { %v1404_v23 = vadd.f32 %v1399_v22, %v1350_v18  ;;  %v1914_v24 = vpop.f32.mrb[43].mxu1  ;;  %v1732_v22 = vld [vmem:[#allocation22] ss:$0 sm:$0xff] }
 0x7f4   :  { %v1450_v25 = vpop.f32.mrb[36].mxu0 }
 0x7f5   :  { %v1457_v26 = vadd.f32 %v1450_v25, %v1403_v21  ;;  %v1919_v27 = vpop.f32.mrb[37].mxu0 }
 0x7f6   :  { %v1453_v28 = vpop.f32.mrb[38].mxu0 }
 0x7f7   :  { %v2862_v29 = vadd.f32 %v1457_v26, %v2635_v0  ;;  %v1458_v30 = vadd.f32 %v1453_v28, %v1404_v23  ;;  %v1920_v31 = vpop.f32.mrb[39].mxu0 }
 0x7f9   :  { %v2865_v32 = vadd.f32 %v1458_v30, %v2637_v1  ;;  %v1463_v33 = vsel %vm210_vm0, %v2862_v29, 0.0 }
 0x7fa   :  { %1464 = vadd.xlane.f32.xlu1 %v1463_v33 }
 0x7fb   :  { %v1466_v34 = vsel %vm210_vm0, %v2865_v32, 0.0 }
 0x7fc   :  { %1467 = vadd.xlane.f32.xlu0 %v1466_v34 }
 0x887   :  { %v1465_v35 = vpop.xlane.xlu1 %1464 }
 0x888   :  { %v1469_v36 = vmul.f32 0.03125, %v1465_v35 }
 0x889   :  { %v1468_v38 = vpop.xlane.xlu0 %1467 }
 0x88a   :  { %v1471_v39 = vsub.f32 %v2862_v29, %v1469_v36  ;;  %v1470_v0 = vmul.f32 0.03125, %v1468_v38 }
 0x88c   :  { %v1472_v40 = vsub.f32 %v2865_v32, %v1470_v0  ;;  %v1473_v41 = vmul.f32 %v1471_v39, %v1471_v39 }
 0x88e   :  { %v1475_v1 = vsel %vm210_vm0, %v1473_v41, 0.0  ;;  %v1474_v55 = vmul.f32 %v1472_v40, %v1472_v40 }
 0x88f   :  { %1476 = vadd.xlane.f32.xlu0 %v1475_v1 }
 0x890   :  { %v1478_v43 = vsel %vm210_vm0, %v1474_v55, 0.0 }
 0x893   :  { %1479 = vadd.xlane.f32.xlu0 %v1478_v43 }
 0x91c   :  { %v1477_v44 = vpop.xlane.xlu0 %1476 }
 0x91d   :  { %v1481_v45 = vmul.f32 0.03125, %v1477_v44 }
 0x91f   :  { %v1483_v46 = vadd.f32 1e-06, %v1481_v45 }
 0x920   :  { %v1480_v47 = vpop.xlane.xlu0 %1479 }
 0x921   :  { %2024 = vrsqrt.f32 %v1483_v46  ;;  %v1482_v48 = vmul.f32 0.03125, %v1480_v47 }
 0x923   :  { %v1484_v49 = vadd.f32 1e-06, %v1482_v48 }
 0x925   :  { %2026 = vrsqrt.f32 %v1484_v49 }
 0x92b   :  { %v2025_v52 = vpop.eup %2024 }
 0x92c   :  { %v1487_v53 = vmul.f32 %v2025_v52, %v1471_v39 }
 0x92e   :  { %v1495_v58 = vmul.f32 %v1726_v54, %v1487_v53 }
 0x92f   :  { %v2027_v57 = vpop.eup %2026 }
 0x930   :  { %v1488_v59 = vmul.f32 %v2027_v57, %v1472_v40  ;;  %v1503_v2 = vadd.f32 %v1727_v60, %v1495_v58 }
 0x932   :  { %v1496_v63 = vmul.f32 %v1726_v54, %v1488_v59 }
 0x934   :  { %v1504_v3 = vadd.f32 %v1727_v60, %v1496_v63 }
 0x936   :  { %v1505_v4 = vpack.c.bf16 %v1504_v3, %v1503_v2 }
 0x938   :  { %1926 = vmatmul.mubr.msk.bf16.vlgmr.msra.gmra.mrb[44].mxu1 %vm210_vm0, %v1505_v4 }
 0xa0b   :  { %v1566_v9 = vpop.f32.mrb[44].mxu1 }
 0xa0c   :  { %v1567_v50 = vadd.f32 %v1728_v8, %v1566_v9  ;;  %v1927_v42 = vpop.f32.mrb[45].mxu1 }
 0xa0d   :  { %v1569_v51 = vpop.f32.mrb[46].mxu1 }
 0xa0e   :  { %v1575_v10 = vmul.f32 0.70710677, %v1567_v50  ;;  %v1570_v11 = vadd.f32 %v1728_v8, %v1569_v51  ;;  %v1928_v12 = vpop.f32.mrb[47].mxu1  ;;  %v1573_v18 = vmul.f32 0.5, %v1567_v50 }
 0xa10   :  { %2028 = verf.f32 %v1575_v10  ;;  %v1576_v13 = vmul.f32 0.70710677, %v1570_v11  ;;  %v1574_v19 = vmul.f32 0.5, %v1570_v11 }
 0xa12   :  { %2030 = verf.f32 %v1576_v13 }
 0xa1a   :  { %v2029_v14 = vpop.eup %2028 }
 0xa1b   :  { %v1579_v16 = vadd.f32 1.0, %v2029_v14 }
 0xa1c   :  { %v2031_v17 = vpop.eup %2030 }
 0xa1d   :  { %v1580_v20 = vadd.f32 1.0, %v2031_v17  ;;  %v1581_v15 = vmul.f32 %v1579_v16, %v1573_v18 }
 0xa1f   :  { %v1582_v21 = vmul.f32 %v1580_v20, %v1574_v19 }
 0xa21   :  { %v1583_v56 = vpack.c.bf16 %v1582_v21, %v1581_v15 }
 0xa23   :  { %1938 = vmatmul.mubr.msk.bf16.vlgmr.msra.gmra.mrb[40].mxu0 %vm1623_vm4, %v1583_v56 }
 0xaf6   :  { %v1661_v23 = vpop.f32.mrb[40].mxu0 }
 0xaf7   :  { %v1662_v24 = vadd.f32 %v1732_v22, %v1661_v23  ;;  %v1939_v25 = vpop.f32.mrb[41].mxu0 }
 0xaf8   :  { %v1664_v26 = vpop.f32.mrb[42].mxu0 }
 0xaf9   :  { %v1668_v27 = vadd.f32 %v1662_v24, %v2862_v29  ;;  %v1665_v28 = vadd.f32 %v1732_v22, %v1664_v26  ;;  %v1940_v30 = vpop.f32.mrb[43].mxu0 }
 0xafb   :  { %1670 = vst.msk [vmem:[#allocation23] sm:$0xff] %vm210_vm0, %v1668_v27  ;;  %v1669_v31 = vadd.f32 %v1665_v28, %v2865_v32 }
 0xafd   :  { %1671 = vst.msk [vmem:[#allocation23 + $0x8] sm:$0xff] %vm210_vm0, %v1669_v31 }
 0xafe   :  { %2329 = shalt.err (!%p2326_p10)
}
 0xaff   :  { %s2330_s7 = scalar_lea.hbm %s2912_s13, 256 }
 0xb00   :  { %p2331_p11 = scmp.ne.s32.totalorder %s2912_s13, %s2330_s7  ;;  %p2334_p12 = scmp.lt.u32.totalorder %s2330_s7, %s2912_s13 }
 0xb02   :  { %p2336_p13 = pnand %p2334_p12, %p2331_p11 }
 0xb04   :  { %2339 = shalt.err (!%p2336_p13)
}
 0xb05   :  { %1683 = dma.vmem_to_hbm [thread:$0]  %s1678_s0, 256, %s2912_s13, [#allocation4], %s2365_s11, %s2365_s11, %s2366_s26  }
 0xb06   :  { %2354 = dma.done.wait [#allocation4], 256  }
 0xb07   :  { %2355 = vsyncadd [#allocation4], 4294967040 }
 0xb08   :  { %1687 = vsyncpa [#allocation3], 1 }
 0xb09   :  { %1688 = vsyncpa [#allocation6], 1 }
 0xb0a   :  { %1689 = vsyncpa [#allocation9], 1 }
 0xb0b   :  { %1690 = vsyncpa [#allocation12], 1 }
 0xb0c   :  { %1691 = vsyncpa [#allocation15], 1 }
 0xb0d   :  { %1692 = vsyncpa [#allocation18], 1 }
 0xb0e   :  { %1693 = vsyncpa [#allocation21], 1 }
 0xb0f   :  { %1694 = vsyncpa [#allocation4], 1 }

</bundles_post_ra>
